<compile_context>
chip_gen: v6e
topology: v6e:2x2x1
jax: 0.10.0
libtpu: 0.0.40
codegen_flags: <defaults>
</compile_context>

<pallas_src>
import jax
import jax.numpy as jnp
from jax.experimental import pallas as pl
from jax.experimental.pallas import tpu as pltpu

C_IN = 2048
C_OUT = 512
HW = 49  # 7 * 7
BN_EPS = 1e-5


# ---------------------------------------------------------------------------
# Kernel: o = relu(x @ w_block) * scale + shift   (one step per TensorCore)
# ---------------------------------------------------------------------------
def _linear_relu_bn_kernel(x_ref, w_ref, scale_ref, shift_ref, o_ref):
    # bf16 x bf16 matmul on the MXU, f32 accumulation.
    y = jnp.dot(x_ref[...].astype(w_ref.dtype), w_ref[...],
                preferred_element_type=jnp.float32)
    # ReLU then eval-mode BatchNorm affine (scale/shift broadcast over rows).
    o_ref[...] = jnp.maximum(y, 0.0) * scale_ref[...] + shift_ref[...]


# ---------------------------------------------------------------------------
# Wrapper (pallas_call plumbing)
# ---------------------------------------------------------------------------
def _linear_relu_bn(x_pooled, w_blocked, scale, shift):
    """x_pooled: (B, 2048) f32; w_blocked: (nj, 2048, tn) bf16 -> (B, 512) f32."""
    B, K = x_pooled.shape
    nj, Kw, tn = w_blocked.shape
    assert K == Kw, (K, Kw)
    N = nj * tn

    return pl.pallas_call(
        _linear_relu_bn_kernel,
        out_shape=jax.ShapeDtypeStruct((B, N), jnp.float32),
        grid_spec=pltpu.PrefetchScalarGridSpec(
            num_scalar_prefetch=0,
            grid=(nj,),  # one step per TensorCore; nj=1 on v5e/v6e, 2 on v7x
            in_specs=[
                # 16 KiB pooled activation; same block for every j, so it is
                # fetched once per core and never duplicated across K steps.
                pl.BlockSpec((B, K), lambda j: (0, 0)),
                # Contiguous pre-blocked weight slab for this core.
                pl.BlockSpec((None, K, tn), lambda j: (j, 0, 0)),
                pl.BlockSpec((1, tn), lambda j: (0, j)),   # BN scale
                pl.BlockSpec((1, tn), lambda j: (0, j)),   # BN shift
            ],
            out_specs=pl.BlockSpec((B, tn), lambda j: (0, j)),
        ),
        compiler_params=pltpu.CompilerParams(
            dimension_semantics=("parallel",)),
    )(x_pooled, w_blocked, scale, shift)


def encoder_resnet152(inputs, params):
    """Mirrors EncoderResNet152.forward (inference mode). Returns (B, 512)."""
    B = inputs.shape[0]
    original_features = inputs.reshape(B, C_IN, 7, 7)

    # AvgPool2d(kernel=7, stride=7): mean over the 49 spatial positions,
    # computed on the NCHW-contiguous (B, 2048, 49) view (no transpose copy).
    pooled = jnp.mean(original_features.reshape(B, C_IN, HW), axis=-1)

    return _linear_relu_bn(pooled, params["w"], params["scale"], params["shift"])


# ---------------------------------------------------------------------------
# Parameter init (shapes from the PyTorch __init__) with device-aware
# weight pre-blocking: one contiguous bf16 slab per TensorCore.
# ---------------------------------------------------------------------------
def _n_weight_blocks():
    # v7x has 2 TensorCores/chip (megacore N-split); v5e/v6e have 1.
    try:
        kind = jax.devices()[0].device_kind.lower()
    except Exception:
        return 1
    return 2 if "v7" in kind else 1


def init_params(key, n_blocks=None):
    if n_blocks is None:
        n_blocks = _n_weight_blocks()
    assert C_OUT % n_blocks == 0
    tn = C_OUT // n_blocks

    bound = 1.0 / jnp.sqrt(jnp.float32(C_IN))  # PyTorch Linear default init bound
    # PyTorch Linear weight is (out, in); the kernel wants (in, out).
    w = jax.random.uniform(key, (C_OUT, C_IN), jnp.float32, -bound, bound).T

    # Pre-block into (n_blocks, 2048, tn): block j holds output columns
    # [j*tn, (j+1)*tn), stored as one contiguous slab for a contiguous DMA.
    w_blocked = (
        w.reshape(C_IN, n_blocks, tn).transpose(1, 0, 2).astype(jnp.bfloat16)
    )

    # BatchNorm1d defaults: gamma=1, beta=0, running_mean=0, running_var=1.
    gamma = jnp.ones((C_OUT,), jnp.float32)
    beta = jnp.zeros((C_OUT,), jnp.float32)
    r_mean = jnp.zeros((C_OUT,), jnp.float32)
    r_var = jnp.ones((C_OUT,), jnp.float32)
    scale = gamma / jnp.sqrt(r_var + BN_EPS)
    shift = beta - r_mean * scale

    return dict(
        w=w_blocked,
        w_f32=w,  # only for the reference checks
        scale=scale.reshape(1, C_OUT),
        shift=shift.reshape(1, C_OUT),
    )


# ---------------------------------------------------------------------------
# Pure-JAX references (for correctness checks)
# ---------------------------------------------------------------------------
def reference_bf16(inputs, params):
    """Mirrors the kernel's mixed precision (bf16 inputs/weights, f32 acc)."""
    B = inputs.shape[0]
    pooled = jnp.mean(inputs.reshape(B, C_IN, HW), axis=-1)
    y = jnp.dot(pooled.astype(jnp.bfloat16),
                params["w_f32"].astype(jnp.bfloat16),
                preferred_element_type=jnp.float32)
    return jnp.maximum(y, 0.0) * params["scale"] + params["shift"]


def reference_f32(inputs, params):
    """Full-f32 fidelity reference of the PyTorch module."""
    B = inputs.shape[0]
    pooled = jnp.mean(inputs.reshape(B, C_IN, HW), axis=-1)
    y = jnp.dot(pooled, params["w_f32"], precision=jax.lax.Precision.HIGHEST)
    return jnp.maximum(y, 0.0) * params["scale"] + params["shift"]


if __name__ == "__main__":
    key = jax.random.PRNGKey(0)
    kx, kp = jax.random.split(key)

    B = 2
    x = jax.random.normal(kx, (B, C_IN, 7, 7), jnp.float32)
    params = init_params(kp)

    fwd = jax.jit(encoder_resnet152)
    out = jax.block_until_ready(fwd(x, params))
    assert out.shape == (B, C_OUT)

    # Tight check against the bf16-aware reference (same math as the kernel).
    ref_b = reference_bf16(x, params)
    assert jnp.allclose(out, ref_b, atol=1e-4, rtol=1e-4)

    # Loose check against the full-f32 PyTorch-equivalent reference
    # (bf16 weight/activation rounding only; f32 accumulation preserved).
    ref_f = reference_f32(x, params)
    assert jnp.allclose(out, ref_f, atol=5e-3, rtol=5e-3)

    print("KERNEL_OK")
</pallas_src>

<mosaic_0001>
module attributes {stable_mosaic.version = 11 : i64} {
  func.func @_linear_relu_bn_kernel(%arg0: i32, %arg1: memref<2x2048xf32, #tpu.memory_space<vmem>>, %arg2: memref<1x2048x512xbf16, #tpu.memory_space<vmem>>, %arg3: memref<1x512xf32, #tpu.memory_space<vmem>>, %arg4: memref<1x512xf32, #tpu.memory_space<vmem>>, %arg5: memref<2x512xf32, #tpu.memory_space<vmem>>) attributes {dimension_semantics = [#tpu.dimension_semantics<parallel>], iteration_bounds = array<i64: 1>, scalar_prefetch = 0 : i64, scratch_operands = 0 : i64, tpu.core_type = #tpu.core_type<tc>, window_params = [{pipeline_mode = #tpu.pipeline_mode<synchronous>, transform_indices = @transform_0, window_bounds = array<i64: 2, 2048>}, {transform_indices = @transform_1, window_bounds = array<i64: 1, 2048, 512>}, {transform_indices = @transform_2, window_bounds = array<i64: 1, 512>}, {transform_indices = @transform_3, window_bounds = array<i64: 1, 512>}, {transform_indices = @transform_4, window_bounds = array<i64: 2, 512>}]} {
    %c0 = arith.constant 0 : index
    %c0_0 = arith.constant 0 : index
    %0 = vector.load %arg1[%c0, %c0_0] : memref<2x2048xf32, #tpu.memory_space<vmem>>, vector<2x2048xf32>
    %1 = arith.truncf %0 : vector<2x2048xf32> to vector<2x2048xbf16>
    %c0_1 = arith.constant 0 : index
    %c0_2 = arith.constant 0 : index
    %c0_3 = arith.constant 0 : index
    %2 = vector.load %arg2[%c0_1, %c0_2, %c0_3] : memref<1x2048x512xbf16, #tpu.memory_space<vmem>>, vector<1x2048x512xbf16>
    %3 = vector.shape_cast %2 : vector<1x2048x512xbf16> to vector<2048x512xbf16>
    %cst = arith.constant dense<0.000000e+00> : vector<2x512xf32>
    %4 = tpu.matmul %1, %3, %cst {dimension_numbers = #tpu.dot_dimension_numbers<[1], [0], [0], [1], [0, 0, 1, 1], [], []>} : vector<2x2048xbf16>, vector<2048x512xbf16>, vector<2x512xf32> -> vector<2x512xf32>
    %cst_4 = arith.constant 0.000000e+00 : f32
    %5 = vector.broadcast %cst_4 : f32 to vector<2x512xf32>
    %6 = arith.maximumf %4, %5 : vector<2x512xf32>
    %c0_5 = arith.constant 0 : index
    %c0_6 = arith.constant 0 : index
    %7 = vector.load %arg3[%c0_5, %c0_6] : memref<1x512xf32, #tpu.memory_space<vmem>>, vector<1x512xf32>
    %8 = vector.broadcast %7 : vector<1x512xf32> to vector<2x512xf32>
    %9 = arith.mulf %6, %8 : vector<2x512xf32>
    %c0_7 = arith.constant 0 : index
    %c0_8 = arith.constant 0 : index
    %10 = vector.load %arg4[%c0_7, %c0_8] : memref<1x512xf32, #tpu.memory_space<vmem>>, vector<1x512xf32>
    %11 = vector.broadcast %10 : vector<1x512xf32> to vector<2x512xf32>
    %12 = arith.addf %9, %11 : vector<2x512xf32>
    %c0_9 = arith.constant 0 : index
    %c0_10 = arith.constant 0 : index
    %13 = vector.load %arg5[%c0_9, %c0_10] : memref<2x512xf32, #tpu.memory_space<vmem>>, vector<2x512xf32>
    tpu.vector_store %arg5[%c0_9, %c0_10], %12 {strides = array<i32>} : memref<2x512xf32, #tpu.memory_space<vmem>>, vector<2x512xf32>,
    return
  }
  func.func @transform_0(%arg0: i32) -> (i32, i32) {
    %c0_i32 = arith.constant 0 : i32
    %c0_i32_0 = arith.constant 0 : i32
    %c0_i32_1 = arith.constant 0 : i32
    return %c0_i32, %c0_i32_0 : i32, i32
  }
  func.func @transform_1(%arg0: i32) -> (i32, i32, i32) {
    %c0_i32 = arith.constant 0 : i32
    %c0_i32_0 = arith.constant 0 : i32
    %c0_i32_1 = arith.constant 0 : i32
    return %arg0, %c0_i32, %c0_i32_0 : i32, i32, i32
  }
  func.func @transform_2(%arg0: i32) -> (i32, i32) {
    %c0_i32 = arith.constant 0 : i32
    %c0_i32_0 = arith.constant 0 : i32
    return %c0_i32, %arg0 : i32, i32
  }
  func.func @transform_3(%arg0: i32) -> (i32, i32) {
    %c0_i32 = arith.constant 0 : i32
    %c0_i32_0 = arith.constant 0 : i32
    return %c0_i32, %arg0 : i32, i32
  }
  func.func @transform_4(%arg0: i32) -> (i32, i32) {
    %c0_i32 = arith.constant 0 : i32
    %c0_i32_0 = arith.constant 0 : i32
    return %c0_i32, %arg0 : i32, i32
  }
}

</mosaic_0001>

<bundles_post_ra>
// kernel: encoder_resnet152.1
= control target key start
LH: loop header
LB: loop body
LE: loop exit
PB: predicated region body
PF: predicated region fallthrough
CT: control target
= control target key end

     0   :  { %9 = vsyncpa [#allocation3], 0  ;;  %s5577_s0 = inlined_call_operand.vmem [shape: f32[2,2048], index: 0, kind: input, shape index: {}]   ;;  %s5578_s1 = inlined_call_operand.hbm [shape: bf16[1,2048,512], index: 1, kind: input, shape index: {}]   ;;  %s5579_s2 = inlined_call_operand.hbm [shape: f32[1,512], index: 2, kind: input, shape index: {}]   ;;  %s5580_s3 = inlined_call_operand.hbm [shape: f32[1,512], index: 3, kind: input, shape index: {}]   ;;  %s5581_s4 = inlined_call_operand.hbm [shape: f32[2,512], index: 4, kind: output, shape index: {}]  }
   0x1   :  { %10 = vsyncpa [#allocation6], 0 }
   0x2   :  { %11 = vsyncpa [#allocation4], 0  ;;  %s5363_s15 = smov [#allocation5]   ;;  %s5364_s17 = smov [#allocation2]  }
   0x3   :  { %s32_s16 = sshll.u32 %s5363_s15, 4  ;;  %s19_s18 = sshll.u32 %s5364_s17, 4  ;;  %s33_s16 = int_to_ptr.vmem [resolvable:$true] %s32_s16  ;;  %s20_s18 = int_to_ptr.vmem [resolvable:$true] %s19_s18 }
   0x4   :  { %s5285_s19 = scalar_lea.vmem %s33_s16, 64  ;;  %p5290_p1 = scmp.lt.s32.totalorder %s33_s16, %s33_s16 }
   0x5   :  { %p5286_p0 = scmp.ne.s32.totalorder %s33_s16, %s5285_s19  ;;  %p5291_p2 = scmp.lt.s32.totalorder %s5285_s19, %s5285_s19 }
   0x7   :  { %p5292_p3 = por %p5291_p2, %p5290_p1 }
   0x9   :  { %p5293_p4 = pnand %p5292_p3, %p5286_p0 }
   0xb   :  { %5296 = shalt.err (!%p5293_p4)
}
   0xc   :  { %35 = dma.hbm_to_vmem [thread:$0]  %s5579_s2, 64, %s33_s16, [#allocation6]  }
   0xd   :  { %s5305_s22 = scalar_lea.vmem %s20_s18, 65536  ;;  %p5310_p6 = scmp.lt.s32.totalorder %s20_s18, %s20_s18 }
   0xe   :  { %p5306_p5 = scmp.ne.s32.totalorder %s20_s18, %s5305_s22  ;;  %p5311_p7 = scmp.lt.s32.totalorder %s5305_s22, %s5305_s22 }
  0x10   :  { %p5312_p8 = por %p5311_p7, %p5310_p6 }
  0x12   :  { %p5313_p9 = pnand %p5312_p8, %p5306_p5 }
  0x14   :  { %5316 = shalt.err (!%p5313_p9)
}
  0x15   :  { %s5365_s23 = smov 256   ;;  %s5366_s24 = smov 16  }
  0x16   :  { %25 = dma.hbm_to_vmem [thread:$0]  %s5578_s1, 65536, %s20_s18, [#allocation3], %s5365_s23, %s5365_s23, %s5366_s24  }
  0x17   :  { %s5367_s27 = smov [#allocation7]  }
  0x18   :  { %s42_s28 = sshll.u32 %s5367_s27, 4  ;;  %s43_s28 = int_to_ptr.vmem [resolvable:$true] %s42_s28 }
  0x19   :  { %s5325_s29 = scalar_lea.vmem %s43_s28, 64  ;;  %p5330_p11 = scmp.lt.s32.totalorder %s43_s28, %s43_s28 }
  0x1a   :  { %p5326_p10 = scmp.ne.s32.totalorder %s43_s28, %s5325_s29  ;;  %p5331_p12 = scmp.lt.s32.totalorder %s5325_s29, %s5325_s29 }
  0x1c   :  { %p5332_p13 = por %p5331_p12, %p5330_p11 }
  0x1e   :  { %p5333_p0 = pnand %p5332_p13, %p5326_p10 }
  0x20   :  { %5336 = shalt.err (!%p5333_p0)
}
  0x21   :  { %45 = dma.hbm_to_vmem [thread:$0]  %s5580_s3, 64, %s43_s28, [#allocation6]  }
  0x22   :  { %5357 = dma.done.wait [#allocation3], 65536  }
  0x23   :  { %5358 = vsyncadd [#allocation3], 4294901760 }
  0x24   :  { %5359 = dma.done.wait [#allocation6], 128  }
  0x25   :  { %5360 = vsyncadd [#allocation6], 4294967168  ;;  %v4505_v0 = vld [vmem:[#allocation2 + $0xe4] ss:$16 sps:$4 sm:$0xff]   ;;  %v4509_v2 = vld [vmem:[#allocation2 + $0xe0] ss:$16 sps:$4 sm:$0xff]   ;;  %v67_v38 = vlaneseq }
  0x26   :  { %v4507_v1 = vld [vmem:[#allocation2 + $0x2e4] ss:$16 sps:$4 sm:$0xff]   ;;  %3235 = vmatprep.subr.bf16.mxu0 %v4505_v0  ;;  %v4510_v3 = vld [vmem:[#allocation2 + $0x2e0] ss:$16 sps:$4 sm:$0xff]   ;;  %v5368_v36 = vmov 1983009808  }
  0x27   :  { %3276 = vmatprep.subr.bf16.mxu1 %v4507_v1  ;;  %v4511_v4 = vld [vmem:[#allocation2 + $0xc4] ss:$16 sps:$4 sm:$0xff]   ;;  %3236 = vmatpush1.bf16.msra.mxu0 %v4509_v2  ;;  %v4515_v6 = vld [vmem:[#allocation2 + $0xc0] ss:$16 sps:$4 sm:$0xff]   ;;  %v65_v37 = vunpack.c.l.s4 %v5368_v36  ;;  %v5404_v43 = vshrl.u32 %v67_v38, 7 }
  0x28   :  { %3277 = vmatpush1.bf16.msra.mxu1 %v4510_v3  ;;  %v4513_v5 = vld [vmem:[#allocation2 + $0x2c4] ss:$16 sps:$4 sm:$0xff]   ;;  %3237 = vmatprep.subr.bf16.mxu0 %v4511_v4  ;;  %v4516_v7 = vld [vmem:[#allocation2 + $0x2c0] ss:$16 sps:$4 sm:$0xff]  }
  0x29   :  { %3278 = vmatprep.subr.bf16.mxu1 %v4513_v5  ;;  %v4517_v8 = vld [vmem:[#allocation2 + $0xa4] ss:$16 sps:$4 sm:$0xff]   ;;  %v4521_v10 = vld [vmem:[#allocation2 + $0xa0] ss:$16 sps:$4 sm:$0xff]   ;;  %v66_v42 = vunpack.c.0.s8 %v65_v37 }
  0x2a   :  { %v4519_v9 = vld [vmem:[#allocation2 + $0x2a4] ss:$16 sps:$4 sm:$0xff]   ;;  %v4522_v11 = vld [vmem:[#allocation2 + $0x2a0] ss:$16 sps:$4 sm:$0xff]  }
  0x2b   :  { %3238 = vmatpush1.bf16.msra.mxu0 %v4515_v6  ;;  %v4523_v12 = vld [vmem:[#allocation2 + $0x84] ss:$16 sps:$4 sm:$0xff]   ;;  %v4527_v14 = vld [vmem:[#allocation2 + $0x80] ss:$16 sps:$4 sm:$0xff]   ;;  %v5407_v49 = vsub.s32 %v66_v42, %v5404_v43  ;;  %v56_v42 = vld [vmem:[%s5577_s0 + $0x8] sm:$0xff] }
  0x2c   :  { %3279 = vmatpush1.bf16.msra.mxu1 %v4516_v7  ;;  %3239 = vmatprep.subr.bf16.mxu0 %v4517_v8  ;;  %v4525_v13 = vld [vmem:[#allocation2 + $0x284] ss:$16 sps:$4 sm:$0xff]   ;;  %v4528_v15 = vld [vmem:[#allocation2 + $0x280] ss:$16 sps:$4 sm:$0xff]  }
  0x2d   :  { %3280 = vmatprep.subr.bf16.mxu1 %v4519_v9  ;;  %v4529_v16 = vld [vmem:[#allocation2 + $0x64] ss:$16 sps:$4 sm:$0xff]   ;;  %v4533_v18 = vld [vmem:[#allocation2 + $0x60] ss:$16 sps:$4 sm:$0xff]  }
  0x2e   :  { %v4531_v17 = vld [vmem:[#allocation2 + $0x264] ss:$16 sps:$4 sm:$0xff]   ;;  %v4534_v19 = vld [vmem:[#allocation2 + $0x260] ss:$16 sps:$4 sm:$0xff]  }
  0x2f   :  { %3240 = vmatpush1.bf16.msra.mxu0 %v4521_v10  ;;  %v4535_v20 = vld [vmem:[#allocation2 + $0x44] ss:$16 sps:$4 sm:$0xff]   ;;  %v4539_v22 = vld [vmem:[#allocation2 + $0x40] ss:$16 sps:$4 sm:$0xff]  }
  0x30   :  { %3281 = vmatpush1.bf16.msra.mxu1 %v4522_v11  ;;  %3241 = vmatprep.subr.bf16.mxu0 %v4523_v12  ;;  %v4537_v21 = vld [vmem:[#allocation2 + $0x244] ss:$16 sps:$4 sm:$0xff]   ;;  %v4540_v23 = vld [vmem:[#allocation2 + $0x240] ss:$16 sps:$4 sm:$0xff]  }
  0x31   :  { %3282 = vmatprep.subr.bf16.mxu1 %v4525_v13  ;;  %v4541_v24 = vld [vmem:[#allocation2 + $0x24] ss:$16 sps:$4 sm:$0xff]   ;;  %v4545_v26 = vld [vmem:[#allocation2 + $0x20] ss:$16 sps:$4 sm:$0xff]  }
  0x32   :  { %v4543_v25 = vld [vmem:[#allocation2 + $0x224] ss:$16 sps:$4 sm:$0xff]   ;;  %v4546_v27 = vld [vmem:[#allocation2 + $0x220] ss:$16 sps:$4 sm:$0xff]  }
  0x33   :  { %3242 = vmatpush1.bf16.msra.mxu0 %v4527_v14  ;;  %v4547_v28 = vld [vmem:[#allocation2 + $0x4] ss:$16 sps:$4 sm:$0xff]   ;;  %v4551_v30 = vld [vmem:[#allocation2] ss:$16 sps:$4 sm:$0xff]  }
  0x34   :  { %3283 = vmatpush1.bf16.msra.mxu1 %v4528_v15  ;;  %3243 = vmatprep.subr.bf16.mxu0 %v4529_v16  ;;  %v4549_v29 = vld [vmem:[#allocation2 + $0x204] ss:$16 sps:$4 sm:$0xff]   ;;  %v4552_v31 = vld [vmem:[#allocation2 + $0x200] ss:$16 sps:$4 sm:$0xff]  }
  0x35   :  { %3284 = vmatprep.subr.bf16.mxu1 %v4531_v17  ;;  %v4553_v32 = vld [vmem:[#allocation2 + $0x1e4] ss:$16 sps:$4 sm:$0xff]   ;;  %v4557_v34 = vld [vmem:[#allocation2 + $0x1e0] ss:$16 sps:$4 sm:$0xff]  }
  0x36   :  { %v4555_v33 = vld [vmem:[#allocation2 + $0x3e4] ss:$16 sps:$4 sm:$0xff]   ;;  %v4558_v35 = vld [vmem:[#allocation2 + $0x3e0] ss:$16 sps:$4 sm:$0xff]  }
  0x37   :  { %3244 = vmatpush1.bf16.msra.mxu0 %v4533_v18  ;;  %v4559_v39 = vld [vmem:[#allocation2 + $0x1c4] ss:$16 sps:$4 sm:$0xff]   ;;  %v4563_v41 = vld [vmem:[#allocation2 + $0x1c0] ss:$16 sps:$4 sm:$0xff]  }
  0x38   :  { %3285 = vmatpush1.bf16.msra.mxu1 %v4534_v19  ;;  %3245 = vmatprep.subr.bf16.mxu0 %v4535_v20  ;;  %v4561_v40 = vld [vmem:[#allocation2 + $0x3c4] ss:$16 sps:$4 sm:$0xff]   ;;  %v4564_v44 = vld [vmem:[#allocation2 + $0x3c0] ss:$16 sps:$4 sm:$0xff]  }
  0x39   :  { %3286 = vmatprep.subr.bf16.mxu1 %v4537_v21  ;;  %v4565_v45 = vld [vmem:[#allocation2 + $0x1a4] ss:$16 sps:$4 sm:$0xff]   ;;  %v4569_v47 = vld [vmem:[#allocation2 + $0x1a0] ss:$16 sps:$4 sm:$0xff]  }
  0x3a   :  { %v4567_v46 = vld [vmem:[#allocation2 + $0x3a4] ss:$16 sps:$4 sm:$0xff]   ;;  %v4570_v48 = vld [vmem:[#allocation2 + $0x3a0] ss:$16 sps:$4 sm:$0xff]  }
  0x3b   :  { %3246 = vmatpush1.bf16.msra.mxu0 %v4539_v22  ;;  %v4571_v50 = vld [vmem:[#allocation2 + $0x184] ss:$16 sps:$4 sm:$0xff]   ;;  %v4575_v53 = vld [vmem:[#allocation2 + $0x180] ss:$16 sps:$4 sm:$0xff]  }
  0x3c   :  { %3287 = vmatpush1.bf16.msra.mxu1 %v4540_v23  ;;  %3247 = vmatprep.subr.bf16.mxu0 %v4541_v24  ;;  %v4573_v51 = vld [vmem:[#allocation2 + $0x384] ss:$16 sps:$4 sm:$0xff]   ;;  %v4576_v56 = vld [vmem:[#allocation2 + $0x380] ss:$16 sps:$4 sm:$0xff]  }
  0x3d   :  { %3288 = vmatprep.subr.bf16.mxu1 %v4543_v25  ;;  %v55_v52 = vld [vmem:[%s5577_s0] sm:$0xff] }
  0x3e   :  { %v70_v54 = vrot.slane %v55_v52, %v5407_v49  ;;  %v63_v55 = vcombine.high %v55_v52, %v55_v52  ;;  %v4577_v57 = vld [vmem:[#allocation2 + $0x164] ss:$16 sps:$4 sm:$0xff]   ;;  %v4581_v61 = vld [vmem:[#allocation2 + $0x160] ss:$16 sps:$4 sm:$0xff]  }
  0x3f   :  { %3248 = vmatpush1.bf16.msra.mxu0 %v4545_v26  ;;  %v4579_v58 = vld [vmem:[#allocation2 + $0x364] ss:$16 sps:$4 sm:$0xff]   ;;  %v4582_v0 = vld [vmem:[#allocation2 + $0x360] ss:$16 sps:$4 sm:$0xff]  }
  0x40   :  { %3289 = vmatpush1.bf16.msra.mxu1 %v4546_v27  ;;  %3249 = vmatprep.subr.bf16.mxu0 %v4547_v28  ;;  %v78_v59 = vcombine.high %v70_v54, %v70_v54  ;;  %v77_v60 = vrot.slane %v63_v55, %v5407_v49  ;;  %v4583_v1 = vld [vmem:[#allocation2 + $0x144] ss:$16 sps:$4 sm:$0xff]   ;;  %v4587_v4 = vld [vmem:[#allocation2 + $0x140] ss:$16 sps:$4 sm:$0xff]   ;;  %v5420_v16 = vpack.c.bf16 %v70_v54, %v70_v54 }
  0x41   :  { %3290 = vmatprep.subr.bf16.mxu1 %v4549_v29  ;;  %v4585_v2 = vld [vmem:[#allocation2 + $0x344] ss:$16 sps:$4 sm:$0xff]   ;;  %v4588_v5 = vld [vmem:[#allocation2 + $0x340] ss:$16 sps:$4 sm:$0xff]  }
  0x42   :  { %v5414_v62 = vpack.c.bf16 %v78_v59, %v78_v59  ;;  %v79_v63 = vcombine.high %v77_v60, %v77_v60  ;;  %v4589_v6 = vld [vmem:[#allocation2 + $0x124] ss:$16 sps:$4 sm:$0xff]   ;;  %v4593_v8 = vld [vmem:[#allocation2 + $0x120] ss:$16 sps:$4 sm:$0xff]   ;;  %v5422_v17 = vpack.c.bf16 %v77_v60, %v77_v60 }
  0x43   :  { %3250 = vmatpush1.bf16.msra.mxu0 %v4551_v30  ;;  %v4591_v7 = vld [vmem:[#allocation2 + $0x324] ss:$16 sps:$4 sm:$0xff]   ;;  %v4594_v9 = vld [vmem:[#allocation2 + $0x320] ss:$16 sps:$4 sm:$0xff]  }
  0x44   :  { %3291 = vmatpush1.bf16.msra.mxu1 %v4552_v31  ;;  %3251 = vmatprep.subr.bf16.mxu0 %v4553_v32  ;;  %v5416_v3 = vpack.c.bf16 %v79_v63, %v79_v63  ;;  %v4595_v10 = vld [vmem:[#allocation2 + $0x104] ss:$16 sps:$4 sm:$0xff]   ;;  %v4599_v12 = vld [vmem:[#allocation2 + $0x100] ss:$16 sps:$4 sm:$0xff]  }
  0x45   :  { %3292 = vmatprep.subr.bf16.mxu1 %v4555_v33  ;;  %3267 = vmatprep.mubr.bf16.mxu0 %v5414_v62  ;;  %v4597_v11 = vld [vmem:[#allocation2 + $0x304] ss:$16 sps:$4 sm:$0xff]   ;;  %v4600_v13 = vld [vmem:[#allocation2 + $0x300] ss:$16 sps:$4 sm:$0xff]  }
  0x46   :  { %3308 = vmatprep.mubr.bf16.mxu1 %v5416_v3  ;;  %v4604_v14 = vld [vmem:[#allocation2 + $0x4e4] ss:$16 sps:$4 sm:$0xff]   ;;  %v4602_v18 = vld [vmem:[#allocation2 + $0x4e0] ss:$16 sps:$4 sm:$0xff]  }
  0x47   :  { %3252 = vmatpush2.bf16.msra.mxu0 %v4557_v34  ;;  %v4607_v15 = vld [vmem:[#allocation2 + $0x6e4] ss:$16 sps:$4 sm:$0xff]   ;;  %v4605_v19 = vld [vmem:[#allocation2 + $0x6e0] ss:$16 sps:$4 sm:$0xff]  }
  0x48   :  { %3293 = vmatpush2.bf16.msra.mxu1 %v4558_v35  ;;  %3253 = vmatprep.subr.bf16.mxu0 %v4559_v39  ;;  %v4610_v20 = vld [vmem:[#allocation2 + $0x4c4] ss:$16 sps:$4 sm:$0xff]   ;;  %v4608_v22 = vld [vmem:[#allocation2 + $0x4c0] ss:$16 sps:$4 sm:$0xff]  }
  0x49   :  { %3294 = vmatprep.subr.bf16.mxu1 %v4561_v40  ;;  %v4613_v21 = vld [vmem:[#allocation2 + $0x6c4] ss:$16 sps:$4 sm:$0xff]   ;;  %v4611_v23 = vld [vmem:[#allocation2 + $0x6c0] ss:$16 sps:$4 sm:$0xff]  }
  0x4a   :  { %v4616_v24 = vld [vmem:[#allocation2 + $0x4a4] ss:$16 sps:$4 sm:$0xff]   ;;  %v4614_v26 = vld [vmem:[#allocation2 + $0x4a0] ss:$16 sps:$4 sm:$0xff]  }
  0x4b   :  { %3254 = vmatpush2.bf16.msra.mxu0 %v4563_v41  ;;  %v4619_v25 = vld [vmem:[#allocation2 + $0x6a4] ss:$16 sps:$4 sm:$0xff]   ;;  %v4617_v27 = vld [vmem:[#allocation2 + $0x6a0] ss:$16 sps:$4 sm:$0xff]  }
  0x4c   :  { %3295 = vmatpush2.bf16.msra.mxu1 %v4564_v44  ;;  %3255 = vmatprep.subr.bf16.mxu0 %v4565_v45  ;;  %v4622_v28 = vld [vmem:[#allocation2 + $0x484] ss:$16 sps:$4 sm:$0xff]   ;;  %v4620_v30 = vld [vmem:[#allocation2 + $0x480] ss:$16 sps:$4 sm:$0xff]   ;;  %v5430_v44 = vrot.slane %v56_v42, %v5407_v49  ;;  %v80_v45 = vcombine.high %v56_v42, %v56_v42 }
  0x4d   :  { %3296 = vmatprep.subr.bf16.mxu1 %v4567_v46  ;;  %v4625_v29 = vld [vmem:[#allocation2 + $0x684] ss:$16 sps:$4 sm:$0xff]   ;;  %v4623_v31 = vld [vmem:[#allocation2 + $0x680] ss:$16 sps:$4 sm:$0xff]  }
  0x4e   :  { %v4628_v32 = vld [vmem:[#allocation2 + $0x464] ss:$16 sps:$4 sm:$0xff]   ;;  %v4626_v34 = vld [vmem:[#allocation2 + $0x460] ss:$16 sps:$4 sm:$0xff]  }
  0x4f   :  { %3256 = vmatpush2.bf16.msra.mxu0 %v4569_v47  ;;  %v4631_v33 = vld [vmem:[#allocation2 + $0x664] ss:$16 sps:$4 sm:$0xff]   ;;  %v4629_v35 = vld [vmem:[#allocation2 + $0x660] ss:$16 sps:$4 sm:$0xff]  }
  0x50   :  { %3297 = vmatpush2.bf16.msra.mxu1 %v4570_v48  ;;  %3257 = vmatprep.subr.bf16.mxu0 %v4571_v50  ;;  %v4634_v36 = vld [vmem:[#allocation2 + $0x444] ss:$16 sps:$4 sm:$0xff]   ;;  %v4632_v38 = vld [vmem:[#allocation2 + $0x440] ss:$16 sps:$4 sm:$0xff]   ;;  %v95_v48 = vcombine.high %v5430_v44, %v5430_v44  ;;  %v5435_v50 = vrot.slane %v80_v45, %v5407_v49 }
  0x51   :  { %3298 = vmatprep.subr.bf16.mxu1 %v4573_v51  ;;  %v4637_v37 = vld [vmem:[#allocation2 + $0x644] ss:$16 sps:$4 sm:$0xff]   ;;  %v4635_v39 = vld [vmem:[#allocation2 + $0x640] ss:$16 sps:$4 sm:$0xff]  }
  0x52   :  { %v4640_v40 = vld [vmem:[#allocation2 + $0x424] ss:$16 sps:$4 sm:$0xff]   ;;  %v4638_v46 = vld [vmem:[#allocation2 + $0x420] ss:$16 sps:$4 sm:$0xff]   ;;  %v96_v54 = vcombine.high %v5435_v50, %v5435_v50 }
  0x53   :  { %3258 = vmatpush2.bf16.msra.mxu0 %v4575_v53  ;;  %v4643_v41 = vld [vmem:[#allocation2 + $0x624] ss:$16 sps:$4 sm:$0xff]   ;;  %v4641_v47 = vld [vmem:[#allocation2 + $0x620] ss:$16 sps:$4 sm:$0xff]   ;;  %v5437_v53 = vpack.c.bf16 %v95_v48, %v95_v48 }
  0x54   :  { %3299 = vmatpush2.bf16.msra.mxu1 %v4576_v56  ;;  %3259 = vmatprep.subr.bf16.mxu0 %v4577_v57  ;;  %v4646_v51 = vld [vmem:[#allocation2 + $0x404] ss:$16 sps:$4 sm:$0xff]   ;;  %v4644_v55 = vld [vmem:[#allocation2 + $0x400] ss:$16 sps:$4 sm:$0xff]   ;;  %v5441_v57 = vpack.c.bf16 %v96_v54, %v96_v54 }
  0x55   :  { %3300 = vmatprep.subr.bf16.mxu1 %v4579_v58  ;;  %v4649_v52 = vld [vmem:[#allocation2 + $0x604] ss:$16 sps:$4 sm:$0xff]   ;;  %v4647_v56 = vld [vmem:[#allocation2 + $0x600] ss:$16 sps:$4 sm:$0xff]  }
  0x56   :  { %v4652_v58 = vld [vmem:[#allocation2 + $0x5e4] ss:$16 sps:$4 sm:$0xff]   ;;  %v4650_v60 = vld [vmem:[#allocation2 + $0x5e0] ss:$16 sps:$4 sm:$0xff]  }
  0x57   :  { %3260 = vmatpush2.bf16.msra.mxu0 %v4581_v61  ;;  %v4655_v59 = vld [vmem:[#allocation2 + $0x7e4] ss:$16 sps:$4 sm:$0xff]   ;;  %v4653_v61 = vld [vmem:[#allocation2 + $0x7e0] ss:$16 sps:$4 sm:$0xff]  }
  0x58   :  { %3301 = vmatpush2.bf16.msra.mxu1 %v4582_v0  ;;  %3261 = vmatprep.subr.bf16.mxu0 %v4583_v1  ;;  %v4658_v63 = vld [vmem:[#allocation2 + $0x5c4] ss:$16 sps:$4 sm:$0xff]   ;;  %v4656_v1 = vld [vmem:[#allocation2 + $0x5c0] ss:$16 sps:$4 sm:$0xff]  }
  0x59   :  { %3302 = vmatprep.subr.bf16.mxu1 %v4585_v2  ;;  %v4661_v0 = vld [vmem:[#allocation2 + $0x7c4] ss:$16 sps:$4 sm:$0xff]   ;;  %v4659_v2 = vld [vmem:[#allocation2 + $0x7c0] ss:$16 sps:$4 sm:$0xff]  }
  0x5a   :  { %v4708_v45 = vld [vmem:[#allocation2 + $0xac0] ss:$16 sps:$4 sm:$0xff]  }
  0x5b   :  { %3262 = vmatpush2.bf16.msra.mxu0 %v4587_v4  ;;  %v4664_v4 = vld [vmem:[#allocation2 + $0x5a4] ss:$16 sps:$4 sm:$0xff]   ;;  %v4714_v54 = vld [vmem:[#allocation2 + $0xaa0] ss:$16 sps:$4 sm:$0xff]  }
  0x5c   :  { %3303 = vmatpush2.bf16.msra.mxu1 %v4588_v5  ;;  %3263 = vmatprep.subr.bf16.mxu0 %v4589_v6  ;;  %v4667_v5 = vld [vmem:[#allocation2 + $0x7a4] ss:$16 sps:$4 sm:$0xff]   ;;  %v4662_v6 = vld [vmem:[#allocation2 + $0x5a0] ss:$16 sps:$4 sm:$0xff]  }
  0x5d   :  { %3304 = vmatprep.subr.bf16.mxu1 %v4591_v7  ;;  %v4665_v7 = vld [vmem:[#allocation2 + $0x7a0] ss:$16 sps:$4 sm:$0xff]  }
  0x5f   :  { %3264 = vmatpush2.bf16.msra.mxu0 %v4593_v8  ;;  %v4670_v8 = vld [vmem:[#allocation2 + $0x584] ss:$16 sps:$4 sm:$0xff]  }
  0x60   :  { %3305 = vmatpush2.bf16.msra.mxu1 %v4594_v9  ;;  %3265 = vmatprep.subr.bf16.mxu0 %v4595_v10  ;;  %v4673_v9 = vld [vmem:[#allocation2 + $0x784] ss:$16 sps:$4 sm:$0xff]   ;;  %v4668_v10 = vld [vmem:[#allocation2 + $0x580] ss:$16 sps:$4 sm:$0xff]  }
  0x61   :  { %3306 = vmatprep.subr.bf16.mxu1 %v4597_v11  ;;  %v4671_v11 = vld [vmem:[#allocation2 + $0x780] ss:$16 sps:$4 sm:$0xff]  }
  0x63   :  { %3266 = vmatpush2.bf16.msra.mxu0 %v4599_v12  ;;  %v4676_v12 = vld [vmem:[#allocation2 + $0x564] ss:$16 sps:$4 sm:$0xff]  }
  0x64   :  { %3307 = vmatpush2.bf16.msra.mxu1 %v4600_v13  ;;  %3317 = vmatprep.subr.bf16.mxu0 %v4604_v14  ;;  %v4679_v13 = vld [vmem:[#allocation2 + $0x764] ss:$16 sps:$4 sm:$0xff]   ;;  %v4674_v14 = vld [vmem:[#allocation2 + $0x560] ss:$16 sps:$4 sm:$0xff]  }
  0x65   :  { %3358 = vmatprep.subr.bf16.mxu1 %v4607_v15  ;;  %v4677_v15 = vld [vmem:[#allocation2 + $0x760] ss:$16 sps:$4 sm:$0xff]  }
  0x66   :  { %3268 = vmatmul.mubr.bf16.vlgmr.msra.gmra.mxu0 %v5420_v16 }
  0x67   :  { %3309 = vmatmul.mubr.bf16.vlgmr.msra.gmra.mxu1 %v5422_v17  ;;  %3318 = vmatpush1.bf16.msra.mxu0 %v4602_v18  ;;  %v4682_v18 = vld [vmem:[#allocation2 + $0x544] ss:$16 sps:$4 sm:$0xff]  }
  0x68   :  { %3359 = vmatpush1.bf16.msra.mxu1 %v4605_v19  ;;  %3319 = vmatprep.subr.bf16.mxu0 %v4610_v20  ;;  %v4685_v19 = vld [vmem:[#allocation2 + $0x744] ss:$16 sps:$4 sm:$0xff]   ;;  %v4680_v20 = vld [vmem:[#allocation2 + $0x540] ss:$16 sps:$4 sm:$0xff]  }
  0x69   :  { %3360 = vmatprep.subr.bf16.mxu1 %v4613_v21  ;;  %3349 = vmatprep.mubr.bf16.mxu0 %v5437_v53  ;;  %v4683_v21 = vld [vmem:[#allocation2 + $0x740] ss:$16 sps:$4 sm:$0xff]  }
  0x6a   :  { %3390 = vmatprep.mubr.bf16.mxu1 %v5441_v57 }
  0x6b   :  { %3320 = vmatpush1.bf16.msra.mxu0 %v4608_v22  ;;  %v4688_v22 = vld [vmem:[#allocation2 + $0x524] ss:$16 sps:$4 sm:$0xff]  }
  0x6c   :  { %3361 = vmatpush1.bf16.msra.mxu1 %v4611_v23  ;;  %3321 = vmatprep.subr.bf16.mxu0 %v4616_v24  ;;  %v4691_v23 = vld [vmem:[#allocation2 + $0x724] ss:$16 sps:$4 sm:$0xff]   ;;  %v4686_v24 = vld [vmem:[#allocation2 + $0x520] ss:$16 sps:$4 sm:$0xff]  }
  0x6d   :  { %3362 = vmatprep.subr.bf16.mxu1 %v4619_v25  ;;  %v4689_v25 = vld [vmem:[#allocation2 + $0x720] ss:$16 sps:$4 sm:$0xff]  }
  0x6f   :  { %3322 = vmatpush1.bf16.msra.mxu0 %v4614_v26  ;;  %v4694_v26 = vld [vmem:[#allocation2 + $0x504] ss:$16 sps:$4 sm:$0xff]  }
  0x70   :  { %3363 = vmatpush1.bf16.msra.mxu1 %v4617_v27  ;;  %3323 = vmatprep.subr.bf16.mxu0 %v4622_v28  ;;  %v4697_v27 = vld [vmem:[#allocation2 + $0x704] ss:$16 sps:$4 sm:$0xff]   ;;  %v4692_v28 = vld [vmem:[#allocation2 + $0x500] ss:$16 sps:$4 sm:$0xff]  }
  0x71   :  { %3364 = vmatprep.subr.bf16.mxu1 %v4625_v29  ;;  %v4695_v29 = vld [vmem:[#allocation2 + $0x700] ss:$16 sps:$4 sm:$0xff]  }
  0x73   :  { %3324 = vmatpush1.bf16.msra.mxu0 %v4620_v30  ;;  %v4701_v30 = vld [vmem:[#allocation2 + $0x8e4] ss:$16 sps:$4 sm:$0xff]  }
  0x74   :  { %3365 = vmatpush1.bf16.msra.mxu1 %v4623_v31  ;;  %3325 = vmatprep.subr.bf16.mxu0 %v4628_v32  ;;  %v4704_v31 = vld [vmem:[#allocation2 + $0xae4] ss:$16 sps:$4 sm:$0xff]   ;;  %v5447_v32 = vpack.c.bf16 %v5430_v44, %v5430_v44 }
  0x75   :  { %3366 = vmatprep.subr.bf16.mxu1 %v4631_v33  ;;  %v5451_v33 = vpack.c.bf16 %v5435_v50, %v5435_v50 }
  0x77   :  { %3326 = vmatpush1.bf16.msra.mxu0 %v4626_v34  ;;  %v4699_v34 = vld [vmem:[#allocation2 + $0x8e0] ss:$16 sps:$4 sm:$0xff]  }
  0x78   :  { %3367 = vmatpush1.bf16.msra.mxu1 %v4629_v35  ;;  %3327 = vmatprep.subr.bf16.mxu0 %v4634_v36  ;;  %v4702_v35 = vld [vmem:[#allocation2 + $0xae0] ss:$16 sps:$4 sm:$0xff]   ;;  %v4707_v36 = vld [vmem:[#allocation2 + $0x8c4] ss:$16 sps:$4 sm:$0xff]  }
  0x79   :  { %3368 = vmatprep.subr.bf16.mxu1 %v4637_v37  ;;  %v57_v37 = vld [vmem:[%s5577_s0 + $0x10] sm:$0xff] }
  0x7b   :  { %3328 = vmatpush1.bf16.msra.mxu0 %v4632_v38  ;;  %v4710_v38 = vld [vmem:[#allocation2 + $0xac4] ss:$16 sps:$4 sm:$0xff]  }
  0x7c   :  { %3369 = vmatpush1.bf16.msra.mxu1 %v4635_v39  ;;  %3329 = vmatprep.subr.bf16.mxu0 %v4640_v40  ;;  %v5457_v39 = vrot.slane %v57_v37, %v5407_v49  ;;  %v97_v40 = vcombine.high %v57_v37, %v57_v37  ;;  %v4774_v37 = vld [vmem:[#allocation2 + $0xb60] ss:$16 sps:$4 sm:$0xff]  }
  0x7d   :  { %3370 = vmatprep.subr.bf16.mxu1 %v4643_v41  ;;  %v4705_v41 = vld [vmem:[#allocation2 + $0x8c0] ss:$16 sps:$4 sm:$0xff]  }
  0x7e   :  { %v112_v42 = vcombine.high %v5457_v39, %v5457_v39  ;;  %v5464_v44 = vrot.slane %v97_v40, %v5407_v49  ;;  %v4782_v40 = vld [vmem:[#allocation2 + $0xb44] ss:$16 sps:$4 sm:$0xff]  }
  0x7f   :  { %3330 = vmatpush1.bf16.msra.mxu0 %v4638_v46  ;;  %v4713_v46 = vld [vmem:[#allocation2 + $0x8a4] ss:$16 sps:$4 sm:$0xff]  }
  0x80   :  { %3371 = vmatpush1.bf16.msra.mxu1 %v4641_v47  ;;  %3331 = vmatprep.subr.bf16.mxu0 %v4646_v51  ;;  %v4716_v47 = vld [vmem:[#allocation2 + $0xaa4] ss:$16 sps:$4 sm:$0xff]   ;;  %v5466_v48 = vpack.c.bf16 %v112_v42, %v112_v42  ;;  %v113_v50 = vcombine.high %v5464_v44, %v5464_v44  ;;  %v4711_v51 = vld [vmem:[#allocation2 + $0x8a0] ss:$16 sps:$4 sm:$0xff]  }
  0x81   :  { %3372 = vmatprep.subr.bf16.mxu1 %v4649_v52  ;;  %v4780_v42 = vld [vmem:[#allocation2 + $0xb40] ss:$16 sps:$4 sm:$0xff]  }
  0x82   :  { %v5471_v52 = vpack.c.bf16 %v113_v50, %v113_v50 }
  0x83   :  { %3332 = vmatpush1.bf16.msra.mxu0 %v4644_v55  ;;  %v4719_v55 = vld [vmem:[#allocation2 + $0x884] ss:$16 sps:$4 sm:$0xff]  }
  0x84   :  { %3373 = vmatpush1.bf16.msra.mxu1 %v4647_v56  ;;  %3333 = vmatprep.subr.bf16.mxu0 %v4652_v58  ;;  %v4722_v56 = vld [vmem:[#allocation2 + $0xa84] ss:$16 sps:$4 sm:$0xff]   ;;  %v4717_v58 = vld [vmem:[#allocation2 + $0x880] ss:$16 sps:$4 sm:$0xff]  }
  0x85   :  { %3374 = vmatprep.subr.bf16.mxu1 %v4655_v59  ;;  %v4720_v59 = vld [vmem:[#allocation2 + $0xa80] ss:$16 sps:$4 sm:$0xff]  }
  0x87   :  { %3334 = vmatpush2.bf16.msra.mxu0 %v4650_v60  ;;  %v4725_v60 = vld [vmem:[#allocation2 + $0x864] ss:$16 sps:$4 sm:$0xff]  }
  0x88   :  { %3375 = vmatpush2.bf16.msra.mxu1 %v4653_v61  ;;  %3335 = vmatprep.subr.bf16.mxu0 %v4658_v63  ;;  %v4728_v61 = vld [vmem:[#allocation2 + $0xa64] ss:$16 sps:$4 sm:$0xff]   ;;  %v4723_v63 = vld [vmem:[#allocation2 + $0x860] ss:$16 sps:$4 sm:$0xff]  }
  0x89   :  { %3376 = vmatprep.subr.bf16.mxu1 %v4661_v0  ;;  %v4726_v0 = vld [vmem:[#allocation2 + $0xa60] ss:$16 sps:$4 sm:$0xff]  }
  0x8b   :  { %3336 = vmatpush2.bf16.msra.mxu0 %v4656_v1  ;;  %v4731_v1 = vld [vmem:[#allocation2 + $0x844] ss:$16 sps:$4 sm:$0xff]  }
  0x8c   :  { %3377 = vmatpush2.bf16.msra.mxu1 %v4659_v2  ;;  %3337 = vmatprep.subr.bf16.mxu0 %v4664_v4  ;;  %v4734_v2 = vld [vmem:[#allocation2 + $0xa44] ss:$16 sps:$4 sm:$0xff]   ;;  %v4729_v4 = vld [vmem:[#allocation2 + $0x840] ss:$16 sps:$4 sm:$0xff]  }
  0x8d   :  { %3378 = vmatprep.subr.bf16.mxu1 %v4667_v5  ;;  %v4732_v5 = vld [vmem:[#allocation2 + $0xa40] ss:$16 sps:$4 sm:$0xff]  }
  0x8f   :  { %3338 = vmatpush2.bf16.msra.mxu0 %v4662_v6  ;;  %v4737_v6 = vld [vmem:[#allocation2 + $0x824] ss:$16 sps:$4 sm:$0xff]  }
  0x90   :  { %3379 = vmatpush2.bf16.msra.mxu1 %v4665_v7  ;;  %3339 = vmatprep.subr.bf16.mxu0 %v4670_v8  ;;  %v4740_v7 = vld [vmem:[#allocation2 + $0xa24] ss:$16 sps:$4 sm:$0xff]   ;;  %v4735_v8 = vld [vmem:[#allocation2 + $0x820] ss:$16 sps:$4 sm:$0xff]  }
  0x91   :  { %3380 = vmatprep.subr.bf16.mxu1 %v4673_v9  ;;  %v4738_v9 = vld [vmem:[#allocation2 + $0xa20] ss:$16 sps:$4 sm:$0xff]  }
  0x93   :  { %3340 = vmatpush2.bf16.msra.mxu0 %v4668_v10  ;;  %v4743_v10 = vld [vmem:[#allocation2 + $0x804] ss:$16 sps:$4 sm:$0xff]  }
  0x94   :  { %3381 = vmatpush2.bf16.msra.mxu1 %v4671_v11  ;;  %3341 = vmatprep.subr.bf16.mxu0 %v4676_v12  ;;  %v4746_v11 = vld [vmem:[#allocation2 + $0xa04] ss:$16 sps:$4 sm:$0xff]   ;;  %v4741_v12 = vld [vmem:[#allocation2 + $0x800] ss:$16 sps:$4 sm:$0xff]  }
  0x95   :  { %3382 = vmatprep.subr.bf16.mxu1 %v4679_v13  ;;  %v4744_v13 = vld [vmem:[#allocation2 + $0xa00] ss:$16 sps:$4 sm:$0xff]  }
  0x97   :  { %3342 = vmatpush2.bf16.msra.mxu0 %v4674_v14  ;;  %v4749_v14 = vld [vmem:[#allocation2 + $0x9e4] ss:$16 sps:$4 sm:$0xff]  }
  0x98   :  { %3383 = vmatpush2.bf16.msra.mxu1 %v4677_v15  ;;  %3343 = vmatprep.subr.bf16.mxu0 %v4682_v18  ;;  %v4752_v15 = vld [vmem:[#allocation2 + $0xbe4] ss:$16 sps:$4 sm:$0xff]   ;;  %v4747_v18 = vld [vmem:[#allocation2 + $0x9e0] ss:$16 sps:$4 sm:$0xff]  }
  0x99   :  { %3384 = vmatprep.subr.bf16.mxu1 %v4685_v19  ;;  %v4750_v19 = vld [vmem:[#allocation2 + $0xbe0] ss:$16 sps:$4 sm:$0xff]  }
  0x9b   :  { %3344 = vmatpush2.bf16.msra.mxu0 %v4680_v20  ;;  %v4755_v20 = vld [vmem:[#allocation2 + $0x9c4] ss:$16 sps:$4 sm:$0xff]  }
  0x9c   :  { %3385 = vmatpush2.bf16.msra.mxu1 %v4683_v21  ;;  %3345 = vmatprep.subr.bf16.mxu0 %v4688_v22  ;;  %v4758_v21 = vld [vmem:[#allocation2 + $0xbc4] ss:$16 sps:$4 sm:$0xff]   ;;  %v4753_v22 = vld [vmem:[#allocation2 + $0x9c0] ss:$16 sps:$4 sm:$0xff]  }
  0x9d   :  { %3386 = vmatprep.subr.bf16.mxu1 %v4691_v23  ;;  %v4756_v23 = vld [vmem:[#allocation2 + $0xbc0] ss:$16 sps:$4 sm:$0xff]  }
  0x9f   :  { %3346 = vmatpush2.bf16.msra.mxu0 %v4686_v24  ;;  %v4761_v24 = vld [vmem:[#allocation2 + $0x9a4] ss:$16 sps:$4 sm:$0xff]  }
  0xa0   :  { %3387 = vmatpush2.bf16.msra.mxu1 %v4689_v25  ;;  %3347 = vmatprep.subr.bf16.mxu0 %v4694_v26  ;;  %v4764_v25 = vld [vmem:[#allocation2 + $0xba4] ss:$16 sps:$4 sm:$0xff]   ;;  %v4759_v26 = vld [vmem:[#allocation2 + $0x9a0] ss:$16 sps:$4 sm:$0xff]  }
  0xa1   :  { %3388 = vmatprep.subr.bf16.mxu1 %v4697_v27  ;;  %v4762_v27 = vld [vmem:[#allocation2 + $0xba0] ss:$16 sps:$4 sm:$0xff]  }
  0xa3   :  { %3348 = vmatpush2.bf16.msra.mxu0 %v4692_v28  ;;  %v4767_v28 = vld [vmem:[#allocation2 + $0x984] ss:$16 sps:$4 sm:$0xff]  }
  0xa4   :  { %3389 = vmatpush2.bf16.msra.mxu1 %v4695_v29  ;;  %3399 = vmatprep.subr.bf16.mxu0 %v4701_v30  ;;  %v4770_v29 = vld [vmem:[#allocation2 + $0xb84] ss:$16 sps:$4 sm:$0xff]   ;;  %v4765_v30 = vld [vmem:[#allocation2 + $0x980] ss:$16 sps:$4 sm:$0xff]  }
  0xa5   :  { %3440 = vmatprep.subr.bf16.mxu1 %v4704_v31  ;;  %v4768_v31 = vld [vmem:[#allocation2 + $0xb80] ss:$16 sps:$4 sm:$0xff]  }
  0xa6   :  { %3350 = vmatmul.mubr.bf16.vlgmr.msra.gmra.mxu0 %v5447_v32 }
  0xa7   :  { %3391 = vmatmul.mubr.bf16.vlgmr.msra.gmra.mxu1 %v5451_v33  ;;  %3400 = vmatpush1.bf16.msra.mxu0 %v4699_v34  ;;  %v4773_v34 = vld [vmem:[#allocation2 + $0x964] ss:$16 sps:$4 sm:$0xff]  }
  0xa8   :  { %3441 = vmatpush1.bf16.msra.mxu1 %v4702_v35  ;;  %3401 = vmatprep.subr.bf16.mxu0 %v4707_v36  ;;  %v4776_v35 = vld [vmem:[#allocation2 + $0xb64] ss:$16 sps:$4 sm:$0xff]   ;;  %v4771_v36 = vld [vmem:[#allocation2 + $0x960] ss:$16 sps:$4 sm:$0xff]  }
  0xa9   :  { %3442 = vmatprep.subr.bf16.mxu1 %v4710_v38  ;;  %3431 = vmatprep.mubr.bf16.mxu0 %v5466_v48  ;;  %v4779_v38 = vld [vmem:[#allocation2 + $0x944] ss:$16 sps:$4 sm:$0xff]  }
  0xaa   :  { %3472 = vmatprep.mubr.bf16.mxu1 %v5471_v52 }
  0xab   :  { %3402 = vmatpush1.bf16.msra.mxu0 %v4705_v41  ;;  %v4777_v41 = vld [vmem:[#allocation2 + $0x940] ss:$16 sps:$4 sm:$0xff]  }
  0xac   :  { %3443 = vmatpush1.bf16.msra.mxu1 %v4708_v45  ;;  %3403 = vmatprep.subr.bf16.mxu0 %v4713_v46  ;;  %v58_v45 = vld [vmem:[%s5577_s0 + $0x18] sm:$0xff]  ;;  %v4785_v46 = vld [vmem:[#allocation2 + $0x924] ss:$16 sps:$4 sm:$0xff]   ;;  %s5369_s0 = smov [#allocation8]  }
  0xad   :  { %3444 = vmatprep.subr.bf16.mxu1 %v4716_v47  ;;  %v4788_v47 = vld [vmem:[#allocation2 + $0xb24] ss:$16 sps:$4 sm:$0xff]   ;;  %v114_v50 = vcombine.high %v58_v45, %v58_v45  ;;  %s3976_s11 = sshll.u32 %s5369_s0, 4  ;;  %s3977_s11 = int_to_ptr.vmem [resolvable:$true] %s3976_s11 }
  0xae   :  { %s5337_s12 = scalar_lea.vmem %s3977_s11, 128  ;;  %p5342_p2 = scmp.lt.s32.totalorder %s3977_s11, %s3977_s11 }
  0xaf   :  { %3404 = vmatpush1.bf16.msra.mxu0 %v4711_v51  ;;  %v4783_v51 = vld [vmem:[#allocation2 + $0x920] ss:$16 sps:$4 sm:$0xff]   ;;  %p5338_p1 = scmp.ne.s32.totalorder %s3977_s11, %s5337_s12  ;;  %p5343_p3 = scmp.lt.s32.totalorder %s5337_s12, %s5337_s12 }
  0xb0   :  { %3445 = vmatpush1.bf16.msra.mxu1 %v4714_v54  ;;  %3405 = vmatprep.subr.bf16.mxu0 %v4719_v55  ;;  %v4786_v54 = vld [vmem:[#allocation2 + $0xb20] ss:$16 sps:$4 sm:$0xff]   ;;  %v4791_v55 = vld [vmem:[#allocation2 + $0x904] ss:$16 sps:$4 sm:$0xff]  }
  0xb1   :  { %3446 = vmatprep.subr.bf16.mxu1 %v4722_v56  ;;  %v4794_v56 = vld [vmem:[#allocation2 + $0xb04] ss:$16 sps:$4 sm:$0xff]   ;;  %p5344_p4 = por %p5343_p3, %p5342_p2 }
  0xb3   :  { %3406 = vmatpush1.bf16.msra.mxu0 %v4717_v58  ;;  %v5478_v58 = vrot.slane %v58_v45, %v5407_v49  ;;  %v4844_v45 = vld [vmem:[#allocation2 + $0xde0] ss:$16 sps:$4 sm:$0xff]   ;;  %p5345_p5 = pnand %p5344_p4, %p5338_p1 }
  0xb4   :  { %3447 = vmatpush1.bf16.msra.mxu1 %v4720_v59  ;;  %3407 = vmatprep.subr.bf16.mxu0 %v4725_v60  ;;  %v5481_v59 = vrot.slane %v114_v50, %v5407_v49  ;;  %v4789_v60 = vld [vmem:[#allocation2 + $0x900] ss:$16 sps:$4 sm:$0xff]   ;;  %v4855_v50 = vld [vmem:[#allocation2 + $0xfc4] ss:$16 sps:$4 sm:$0xff]  }
  0xb5   :  { %3448 = vmatprep.subr.bf16.mxu1 %v4728_v61  ;;  %v4792_v61 = vld [vmem:[#allocation2 + $0xb00] ss:$16 sps:$4 sm:$0xff]  }
  0xb7   :  { %3408 = vmatpush1.bf16.msra.mxu0 %v4723_v63  ;;  %v4798_v63 = vld [vmem:[#allocation2 + $0xce4] ss:$16 sps:$4 sm:$0xff]  }
  0xb8   :  { %3449 = vmatpush1.bf16.msra.mxu1 %v4726_v0  ;;  %3409 = vmatprep.subr.bf16.mxu0 %v4731_v1  ;;  %v4801_v0 = vld [vmem:[#allocation2 + $0xee4] ss:$16 sps:$4 sm:$0xff]   ;;  %v129_v1 = vcombine.high %v5478_v58, %v5478_v58 }
  0xb9   :  { %3450 = vmatprep.subr.bf16.mxu1 %v4734_v2  ;;  %v130_v2 = vcombine.high %v5481_v59, %v5481_v59 }
  0xbb   :  { %3410 = vmatpush1.bf16.msra.mxu0 %v4729_v4  ;;  %v5489_v4 = vpack.c.bf16 %v5457_v39, %v5457_v39  ;;  %v4802_v39 = vld [vmem:[#allocation2 + $0xcc0] ss:$16 sps:$4 sm:$0xff]  }
  0xbc   :  { %3451 = vmatpush1.bf16.msra.mxu1 %v4732_v5  ;;  %3411 = vmatprep.subr.bf16.mxu0 %v4737_v6  ;;  %v5493_v5 = vpack.c.bf16 %v5464_v44, %v5464_v44  ;;  %v4796_v6 = vld [vmem:[#allocation2 + $0xce0] ss:$16 sps:$4 sm:$0xff]   ;;  %v4810_v44 = vld [vmem:[#allocation2 + $0xca4] ss:$16 sps:$4 sm:$0xff]  }
  0xbd   :  { %3452 = vmatprep.subr.bf16.mxu1 %v4740_v7  ;;  %v4799_v7 = vld [vmem:[#allocation2 + $0xee0] ss:$16 sps:$4 sm:$0xff]  }
  0xbf   :  { %3412 = vmatpush1.bf16.msra.mxu0 %v4735_v8  ;;  %v4804_v8 = vld [vmem:[#allocation2 + $0xcc4] ss:$16 sps:$4 sm:$0xff]  }
  0xc0   :  { %3453 = vmatpush1.bf16.msra.mxu1 %v4738_v9  ;;  %3413 = vmatprep.subr.bf16.mxu0 %v4743_v10  ;;  %v4807_v9 = vld [vmem:[#allocation2 + $0xec4] ss:$16 sps:$4 sm:$0xff]   ;;  %v5495_v10 = vpack.c.bf16 %v129_v1, %v129_v1  ;;  %v4862_v1 = vld [vmem:[#allocation2 + $0xd80] ss:$16 sps:$4 sm:$0xff]  }
  0xc1   :  { %3454 = vmatprep.subr.bf16.mxu1 %v4746_v11  ;;  %v5497_v11 = vpack.c.bf16 %v130_v2, %v130_v2  ;;  %v4865_v2 = vld [vmem:[#allocation2 + $0xf80] ss:$16 sps:$4 sm:$0xff]  }
  0xc3   :  { %3414 = vmatpush1.bf16.msra.mxu0 %v4741_v12  ;;  %v4805_v12 = vld [vmem:[#allocation2 + $0xec0] ss:$16 sps:$4 sm:$0xff]  }
  0xc4   :  { %3455 = vmatpush1.bf16.msra.mxu1 %v4744_v13  ;;  %3415 = vmatprep.subr.bf16.mxu0 %v4749_v14  ;;  %v4813_v13 = vld [vmem:[#allocation2 + $0xea4] ss:$16 sps:$4 sm:$0xff]   ;;  %v4808_v14 = vld [vmem:[#allocation2 + $0xca0] ss:$16 sps:$4 sm:$0xff]  }
  0xc5   :  { %3456 = vmatprep.subr.bf16.mxu1 %v4752_v15  ;;  %v4811_v15 = vld [vmem:[#allocation2 + $0xea0] ss:$16 sps:$4 sm:$0xff]  }
  0xc7   :  { %3416 = vmatpush2.bf16.msra.mxu0 %v4747_v18  ;;  %v4816_v18 = vld [vmem:[#allocation2 + $0xc84] ss:$16 sps:$4 sm:$0xff]  }
  0xc8   :  { %3457 = vmatpush2.bf16.msra.mxu1 %v4750_v19  ;;  %3417 = vmatprep.subr.bf16.mxu0 %v4755_v20  ;;  %v4819_v19 = vld [vmem:[#allocation2 + $0xe84] ss:$16 sps:$4 sm:$0xff]   ;;  %v4814_v20 = vld [vmem:[#allocation2 + $0xc80] ss:$16 sps:$4 sm:$0xff]  }
  0xc9   :  { %3458 = vmatprep.subr.bf16.mxu1 %v4758_v21  ;;  %v4817_v21 = vld [vmem:[#allocation2 + $0xe80] ss:$16 sps:$4 sm:$0xff]  }
  0xcb   :  { %3418 = vmatpush2.bf16.msra.mxu0 %v4753_v22  ;;  %v4822_v22 = vld [vmem:[#allocation2 + $0xc64] ss:$16 sps:$4 sm:$0xff]  }
  0xcc   :  { %3459 = vmatpush2.bf16.msra.mxu1 %v4756_v23  ;;  %3419 = vmatprep.subr.bf16.mxu0 %v4761_v24  ;;  %v4825_v23 = vld [vmem:[#allocation2 + $0xe64] ss:$16 sps:$4 sm:$0xff]   ;;  %v4820_v24 = vld [vmem:[#allocation2 + $0xc60] ss:$16 sps:$4 sm:$0xff]  }
  0xcd   :  { %3460 = vmatprep.subr.bf16.mxu1 %v4764_v25  ;;  %v4823_v25 = vld [vmem:[#allocation2 + $0xe60] ss:$16 sps:$4 sm:$0xff]  }
  0xcf   :  { %3420 = vmatpush2.bf16.msra.mxu0 %v4759_v26  ;;  %v4828_v26 = vld [vmem:[#allocation2 + $0xc44] ss:$16 sps:$4 sm:$0xff]  }
  0xd0   :  { %3461 = vmatpush2.bf16.msra.mxu1 %v4762_v27  ;;  %3421 = vmatprep.subr.bf16.mxu0 %v4767_v28  ;;  %v4831_v27 = vld [vmem:[#allocation2 + $0xe44] ss:$16 sps:$4 sm:$0xff]   ;;  %v4826_v28 = vld [vmem:[#allocation2 + $0xc40] ss:$16 sps:$4 sm:$0xff]  }
  0xd1   :  { %3462 = vmatprep.subr.bf16.mxu1 %v4770_v29  ;;  %v4829_v29 = vld [vmem:[#allocation2 + $0xe40] ss:$16 sps:$4 sm:$0xff]  }
  0xd3   :  { %3422 = vmatpush2.bf16.msra.mxu0 %v4765_v30  ;;  %v4834_v30 = vld [vmem:[#allocation2 + $0xc24] ss:$16 sps:$4 sm:$0xff]  }
  0xd4   :  { %3463 = vmatpush2.bf16.msra.mxu1 %v4768_v31  ;;  %3423 = vmatprep.subr.bf16.mxu0 %v4773_v34  ;;  %v4837_v31 = vld [vmem:[#allocation2 + $0xe24] ss:$16 sps:$4 sm:$0xff]   ;;  %v4832_v34 = vld [vmem:[#allocation2 + $0xc20] ss:$16 sps:$4 sm:$0xff]  }
  0xd5   :  { %3464 = vmatprep.subr.bf16.mxu1 %v4776_v35  ;;  %v4835_v35 = vld [vmem:[#allocation2 + $0xe20] ss:$16 sps:$4 sm:$0xff]  }
  0xd7   :  { %3424 = vmatpush2.bf16.msra.mxu0 %v4771_v36  ;;  %v4840_v36 = vld [vmem:[#allocation2 + $0xc04] ss:$16 sps:$4 sm:$0xff]  }
  0xd8   :  { %3465 = vmatpush2.bf16.msra.mxu1 %v4774_v37  ;;  %3425 = vmatprep.subr.bf16.mxu0 %v4779_v38  ;;  %v4843_v37 = vld [vmem:[#allocation2 + $0xe04] ss:$16 sps:$4 sm:$0xff]   ;;  %v4838_v38 = vld [vmem:[#allocation2 + $0xc00] ss:$16 sps:$4 sm:$0xff]  }
  0xd9   :  { %3466 = vmatprep.subr.bf16.mxu1 %v4782_v40  ;;  %v4841_v40 = vld [vmem:[#allocation2 + $0xe00] ss:$16 sps:$4 sm:$0xff]  }
  0xdb   :  { %3426 = vmatpush2.bf16.msra.mxu0 %v4777_v41  ;;  %v4846_v41 = vld [vmem:[#allocation2 + $0xde4] ss:$16 sps:$4 sm:$0xff]  }
  0xdc   :  { %3467 = vmatpush2.bf16.msra.mxu1 %v4780_v42  ;;  %3427 = vmatprep.subr.bf16.mxu0 %v4785_v46  ;;  %v4849_v42 = vld [vmem:[#allocation2 + $0xfe4] ss:$16 sps:$4 sm:$0xff]   ;;  %v4847_v46 = vld [vmem:[#allocation2 + $0xfe0] ss:$16 sps:$4 sm:$0xff]  }
  0xdd   :  { %3468 = vmatprep.subr.bf16.mxu1 %v4788_v47  ;;  %v4852_v47 = vld [vmem:[#allocation2 + $0xdc4] ss:$16 sps:$4 sm:$0xff]  }
  0xdf   :  { %3428 = vmatpush2.bf16.msra.mxu0 %v4783_v51  ;;  %v4850_v51 = vld [vmem:[#allocation2 + $0xdc0] ss:$16 sps:$4 sm:$0xff]  }
  0xe0   :  { %3469 = vmatpush2.bf16.msra.mxu1 %v4786_v54  ;;  %3429 = vmatprep.subr.bf16.mxu0 %v4791_v55  ;;  %v4853_v54 = vld [vmem:[#allocation2 + $0xfc0] ss:$16 sps:$4 sm:$0xff]   ;;  %v4858_v55 = vld [vmem:[#allocation2 + $0xda4] ss:$16 sps:$4 sm:$0xff]  }
  0xe1   :  { %3470 = vmatprep.subr.bf16.mxu1 %v4794_v56  ;;  %v4861_v56 = vld [vmem:[#allocation2 + $0xfa4] ss:$16 sps:$4 sm:$0xff]  }
  0xe3   :  { %3430 = vmatpush2.bf16.msra.mxu0 %v4789_v60  ;;  %v4856_v60 = vld [vmem:[#allocation2 + $0xda0] ss:$16 sps:$4 sm:$0xff]  }
  0xe4   :  { %3471 = vmatpush2.bf16.msra.mxu1 %v4792_v61  ;;  %3481 = vmatprep.subr.bf16.mxu0 %v4798_v63  ;;  %v4859_v61 = vld [vmem:[#allocation2 + $0xfa0] ss:$16 sps:$4 sm:$0xff]   ;;  %v4864_v63 = vld [vmem:[#allocation2 + $0xd84] ss:$16 sps:$4 sm:$0xff]  }
  0xe5   :  { %3522 = vmatprep.subr.bf16.mxu1 %v4801_v0  ;;  %v4867_v0 = vld [vmem:[#allocation2 + $0xf84] ss:$16 sps:$4 sm:$0xff]  }
  0xe6   :  { %3432 = vmatmul.mubr.bf16.vlgmr.msra.gmra.mxu0 %v5489_v4 }
  0xe7   :  { %3473 = vmatmul.mubr.bf16.vlgmr.msra.gmra.mxu1 %v5493_v5  ;;  %3482 = vmatpush1.bf16.msra.mxu0 %v4796_v6  ;;  %v4870_v6 = vld [vmem:[#allocation2 + $0xd64] ss:$16 sps:$4 sm:$0xff]  }
  0xe8   :  { %3523 = vmatpush1.bf16.msra.mxu1 %v4799_v7  ;;  %3483 = vmatprep.subr.bf16.mxu0 %v4804_v8  ;;  %v4873_v7 = vld [vmem:[#allocation2 + $0xf64] ss:$16 sps:$4 sm:$0xff]   ;;  %v4868_v8 = vld [vmem:[#allocation2 + $0xd60] ss:$16 sps:$4 sm:$0xff]  }
  0xe9   :  { %3524 = vmatprep.subr.bf16.mxu1 %v4807_v9  ;;  %3513 = vmatprep.mubr.bf16.mxu0 %v5495_v10  ;;  %v4871_v9 = vld [vmem:[#allocation2 + $0xf60] ss:$16 sps:$4 sm:$0xff]  }
  0xea   :  { %3554 = vmatprep.mubr.bf16.mxu1 %v5497_v11 }
  0xeb   :  { %3484 = vmatpush1.bf16.msra.mxu0 %v4802_v39  ;;  %v4876_v39 = vld [vmem:[#allocation2 + $0xd44] ss:$16 sps:$4 sm:$0xff]  }
  0xec   :  { %3525 = vmatpush1.bf16.msra.mxu1 %v4805_v12  ;;  %3485 = vmatprep.subr.bf16.mxu0 %v4810_v44  ;;  %v4879_v12 = vld [vmem:[#allocation2 + $0xf44] ss:$16 sps:$4 sm:$0xff]   ;;  %v4874_v44 = vld [vmem:[#allocation2 + $0xd40] ss:$16 sps:$4 sm:$0xff]  }
  0xed   :  { %3526 = vmatprep.subr.bf16.mxu1 %v4813_v13  ;;  %v4877_v13 = vld [vmem:[#allocation2 + $0xf40] ss:$16 sps:$4 sm:$0xff]  }
  0xef   :  { %3486 = vmatpush1.bf16.msra.mxu0 %v4808_v14  ;;  %v4882_v14 = vld [vmem:[#allocation2 + $0xd24] ss:$16 sps:$4 sm:$0xff]  }
  0xf0   :  { %3527 = vmatpush1.bf16.msra.mxu1 %v4811_v15  ;;  %3487 = vmatprep.subr.bf16.mxu0 %v4816_v18  ;;  %v4885_v15 = vld [vmem:[#allocation2 + $0xf24] ss:$16 sps:$4 sm:$0xff]   ;;  %v4880_v18 = vld [vmem:[#allocation2 + $0xd20] ss:$16 sps:$4 sm:$0xff]  }
  0xf1   :  { %3528 = vmatprep.subr.bf16.mxu1 %v4819_v19  ;;  %v4883_v19 = vld [vmem:[#allocation2 + $0xf20] ss:$16 sps:$4 sm:$0xff]  }
  0xf3   :  { %3488 = vmatpush1.bf16.msra.mxu0 %v4814_v20  ;;  %v4888_v20 = vld [vmem:[#allocation2 + $0xd04] ss:$16 sps:$4 sm:$0xff]  }
  0xf4   :  { %3529 = vmatpush1.bf16.msra.mxu1 %v4817_v21  ;;  %3489 = vmatprep.subr.bf16.mxu0 %v4822_v22  ;;  %v4891_v21 = vld [vmem:[#allocation2 + $0xf04] ss:$16 sps:$4 sm:$0xff]   ;;  %v4886_v22 = vld [vmem:[#allocation2 + $0xd00] ss:$16 sps:$4 sm:$0xff]  }
  0xf5   :  { %3530 = vmatprep.subr.bf16.mxu1 %v4825_v23  ;;  %v4889_v23 = vld [vmem:[#allocation2 + $0xf00] ss:$16 sps:$4 sm:$0xff]  }
  0xf7   :  { %3490 = vmatpush1.bf16.msra.mxu0 %v4820_v24  ;;  %v4895_v24 = vld [vmem:[#allocation2 + $0xec] ss:$16 sps:$4 sm:$0xff]  }
  0xf8   :  { %3531 = vmatpush1.bf16.msra.mxu1 %v4823_v25  ;;  %3491 = vmatprep.subr.bf16.mxu0 %v4828_v26  ;;  %v4898_v25 = vld [vmem:[#allocation2 + $0x2ec] ss:$16 sps:$4 sm:$0xff]   ;;  %v5505_v26 = vpack.c.bf16 %v5478_v58, %v5478_v58  ;;  %v4899_v58 = vld [vmem:[#allocation2 + $0xc8] ss:$16 sps:$4 sm:$0xff]  }
  0xf9   :  { %3532 = vmatprep.subr.bf16.mxu1 %v4831_v27  ;;  %v5509_v27 = vpack.c.bf16 %v5481_v59, %v5481_v59 }
  0xfb   :  { %3492 = vmatpush1.bf16.msra.mxu0 %v4826_v28  ;;  %v4893_v28 = vld [vmem:[#allocation2 + $0xe8] ss:$16 sps:$4 sm:$0xff]  }
  0xfc   :  { %3533 = vmatpush1.bf16.msra.mxu1 %v4829_v29  ;;  %3493 = vmatprep.subr.bf16.mxu0 %v4834_v30  ;;  %v4896_v29 = vld [vmem:[#allocation2 + $0x2e8] ss:$16 sps:$4 sm:$0xff]   ;;  %v4901_v30 = vld [vmem:[#allocation2 + $0xcc] ss:$16 sps:$4 sm:$0xff]  }
  0xfd   :  { %3534 = vmatprep.subr.bf16.mxu1 %v4837_v31  ;;  %v4904_v31 = vld [vmem:[#allocation2 + $0x2cc] ss:$16 sps:$4 sm:$0xff]  }
  0xff   :  { %3494 = vmatpush1.bf16.msra.mxu0 %v4832_v34 }
 0x100   :  { %3535 = vmatpush1.bf16.msra.mxu1 %v4835_v35  ;;  %3495 = vmatprep.subr.bf16.mxu0 %v4840_v36  ;;  %v4902_v36 = vld [vmem:[#allocation2 + $0x2c8] ss:$16 sps:$4 sm:$0xff]  }
 0x101   :  { %3536 = vmatprep.subr.bf16.mxu1 %v4843_v37 }
 0x103   :  { %3496 = vmatpush1.bf16.msra.mxu0 %v4838_v38 }
 0x104   :  { %3537 = vmatpush1.bf16.msra.mxu1 %v4841_v40  ;;  %3497 = vmatprep.subr.bf16.mxu0 %v4846_v41  ;;  %v4907_v40 = vld [vmem:[#allocation2 + $0xac] ss:$16 sps:$4 sm:$0xff]  }
 0x105   :  { %3538 = vmatprep.subr.bf16.mxu1 %v4849_v42  ;;  %v4910_v41 = vld [vmem:[#allocation2 + $0x2ac] ss:$16 sps:$4 sm:$0xff]  }
 0x107   :  { %3498 = vmatpush2.bf16.msra.mxu0 %v4844_v45  ;;  %v4905_v45 = vld [vmem:[#allocation2 + $0xa8] ss:$16 sps:$4 sm:$0xff]  }
 0x108   :  { %3539 = vmatpush2.bf16.msra.mxu1 %v4847_v46  ;;  %3499 = vmatprep.subr.bf16.mxu0 %v4852_v47  ;;  %v4908_v46 = vld [vmem:[#allocation2 + $0x2a8] ss:$16 sps:$4 sm:$0xff]  }
 0x109   :  { %3540 = vmatprep.subr.bf16.mxu1 %v4855_v50 }
 0x10b   :  { %3500 = vmatpush2.bf16.msra.mxu0 %v4850_v51 }
 0x10c   :  { %3541 = vmatpush2.bf16.msra.mxu1 %v4853_v54  ;;  %3501 = vmatprep.subr.bf16.mxu0 %v4858_v55  ;;  %v4913_v55 = vld [vmem:[#allocation2 + $0x8c] ss:$16 sps:$4 sm:$0xff]  }
 0x10d   :  { %3542 = vmatprep.subr.bf16.mxu1 %v4861_v56  ;;  %v4916_v56 = vld [vmem:[#allocation2 + $0x28c] ss:$16 sps:$4 sm:$0xff]  }
 0x10f   :  { %3502 = vmatpush2.bf16.msra.mxu0 %v4856_v60  ;;  %v4911_v60 = vld [vmem:[#allocation2 + $0x88] ss:$16 sps:$4 sm:$0xff]  }
 0x110   :  { %3543 = vmatpush2.bf16.msra.mxu1 %v4859_v61  ;;  %3503 = vmatprep.subr.bf16.mxu0 %v4864_v63  ;;  %v4914_v61 = vld [vmem:[#allocation2 + $0x288] ss:$16 sps:$4 sm:$0xff]   ;;  %v4919_v63 = vld [vmem:[#allocation2 + $0x6c] ss:$16 sps:$4 sm:$0xff]  }
 0x111   :  { %3544 = vmatprep.subr.bf16.mxu1 %v4867_v0  ;;  %v4920_v0 = vld [vmem:[#allocation2 + $0x268] ss:$16 sps:$4 sm:$0xff]  }
 0x113   :  { %3504 = vmatpush2.bf16.msra.mxu0 %v4862_v1  ;;  %v4925_v1 = vld [vmem:[#allocation2 + $0x4c] ss:$16 sps:$4 sm:$0xff]  }
 0x114   :  { %3545 = vmatpush2.bf16.msra.mxu1 %v4865_v2  ;;  %3505 = vmatprep.subr.bf16.mxu0 %v4870_v6  ;;  %v4928_v2 = vld [vmem:[#allocation2 + $0x24c] ss:$16 sps:$4 sm:$0xff]   ;;  %v4923_v6 = vld [vmem:[#allocation2 + $0x48] ss:$16 sps:$4 sm:$0xff]  }
 0x115   :  { %3546 = vmatprep.subr.bf16.mxu1 %v4873_v7  ;;  %v4926_v7 = vld [vmem:[#allocation2 + $0x248] ss:$16 sps:$4 sm:$0xff]  }
 0x117   :  { %3506 = vmatpush2.bf16.msra.mxu0 %v4868_v8  ;;  %v4931_v8 = vld [vmem:[#allocation2 + $0x2c] ss:$16 sps:$4 sm:$0xff]  }
 0x118   :  { %3547 = vmatpush2.bf16.msra.mxu1 %v4871_v9  ;;  %3507 = vmatprep.subr.bf16.mxu0 %v4876_v39  ;;  %v4934_v9 = vld [vmem:[#allocation2 + $0x22c] ss:$16 sps:$4 sm:$0xff]   ;;  %v4929_v39 = vld [vmem:[#allocation2 + $0x28] ss:$16 sps:$4 sm:$0xff]  }
 0x119   :  { %3548 = vmatprep.subr.bf16.mxu1 %v4879_v12  ;;  %v4932_v12 = vld [vmem:[#allocation2 + $0x228] ss:$16 sps:$4 sm:$0xff]  }
 0x11b   :  { %3508 = vmatpush2.bf16.msra.mxu0 %v4874_v44  ;;  %v4937_v44 = vld [vmem:[#allocation2 + $0xc] ss:$16 sps:$4 sm:$0xff]  }
 0x11c   :  { %3549 = vmatpush2.bf16.msra.mxu1 %v4877_v13  ;;  %3509 = vmatprep.subr.bf16.mxu0 %v4882_v14  ;;  %v4940_v13 = vld [vmem:[#allocation2 + $0x20c] ss:$16 sps:$4 sm:$0xff]   ;;  %v4935_v14 = vld [vmem:[#allocation2 + $0x8] ss:$16 sps:$4 sm:$0xff]  }
 0x11d   :  { %3550 = vmatprep.subr.bf16.mxu1 %v4885_v15  ;;  %v4938_v15 = vld [vmem:[#allocation2 + $0x208] ss:$16 sps:$4 sm:$0xff]  }
 0x11f   :  { %3510 = vmatpush2.bf16.msra.mxu0 %v4880_v18  ;;  %v4943_v18 = vld [vmem:[#allocation2 + $0x1ec] ss:$16 sps:$4 sm:$0xff]  }
 0x120   :  { %3551 = vmatpush2.bf16.msra.mxu1 %v4883_v19  ;;  %3511 = vmatprep.subr.bf16.mxu0 %v4888_v20  ;;  %v4946_v19 = vld [vmem:[#allocation2 + $0x3ec] ss:$16 sps:$4 sm:$0xff]   ;;  %v4941_v20 = vld [vmem:[#allocation2 + $0x1e8] ss:$16 sps:$4 sm:$0xff]  }
 0x121   :  { %3552 = vmatprep.subr.bf16.mxu1 %v4891_v21  ;;  %v4944_v21 = vld [vmem:[#allocation2 + $0x3e8] ss:$16 sps:$4 sm:$0xff]  }
 0x123   :  { %3512 = vmatpush2.bf16.msra.mxu0 %v4886_v22  ;;  %v4949_v22 = vld [vmem:[#allocation2 + $0x1cc] ss:$16 sps:$4 sm:$0xff]  }
 0x124   :  { %3553 = vmatpush2.bf16.msra.mxu1 %v4889_v23  ;;  %3563 = vmatprep.subr.bf16.mxu0 %v4895_v24  ;;  %v4952_v23 = vld [vmem:[#allocation2 + $0x3cc] ss:$16 sps:$4 sm:$0xff]   ;;  %v4947_v24 = vld [vmem:[#allocation2 + $0x1c8] ss:$16 sps:$4 sm:$0xff]  }
 0x125   :  { %3604 = vmatprep.subr.bf16.mxu1 %v4898_v25  ;;  %v4950_v25 = vld [vmem:[#allocation2 + $0x3c8] ss:$16 sps:$4 sm:$0xff]  }
 0x126   :  { %v3269_v34 = vpop.f32.mrf.mxu0  ;;  %3514 = vmatmul.mubr.bf16.vlgmr.msra.gmra.mxu0 %v5505_v26 }
 0x127   :  { %v3310_v35 = vpop.f32.mrf.mxu1  ;;  %3555 = vmatmul.mubr.bf16.vlgmr.msra.gmra.mxu1 %v5509_v27  ;;  %3564 = vmatpush1.bf16.msra.mxu0 %v4893_v28  ;;  %v4955_v28 = vld [vmem:[#allocation2 + $0x1ac] ss:$16 sps:$4 sm:$0xff]  }
 0x128   :  { %v5513_v37 = vadd.f32 %v3310_v35, %v3269_v34  ;;  %3605 = vmatpush1.bf16.msra.mxu1 %v4896_v29  ;;  %v3271_v59 = vpop.f32.mrf.mxu0  ;;  %3565 = vmatprep.subr.bf16.mxu0 %v4901_v30  ;;  %v4958_v29 = vld [vmem:[#allocation2 + $0x3ac] ss:$16 sps:$4 sm:$0xff]   ;;  %v4953_v30 = vld [vmem:[#allocation2 + $0x1a8] ss:$16 sps:$4 sm:$0xff]  }
 0x129   :  { %v3312_v38 = vpop.f32.mrf.mxu1  ;;  %3606 = vmatprep.subr.bf16.mxu1 %v4904_v31  ;;  %3595 = vmatprep.mubr.bf16.mxu0 %v5414_v62  ;;  %v4922_v62 = vld [vmem:[#allocation2 + $0x26c] ss:$16 sps:$4 sm:$0xff]   ;;  %v4956_v31 = vld [vmem:[#allocation2 + $0x3a8] ss:$16 sps:$4 sm:$0xff]  }
 0x12a   :  { %v5515_v42 = vadd.f32 %v3312_v38, %v3271_v59  ;;  %3636 = vmatprep.mubr.bf16.mxu1 %v5416_v3  ;;  %v3273_v47 = vpop.f32.mrf.mxu0  ;;  %v4917_v3 = vld [vmem:[#allocation2 + $0x68] ss:$16 sps:$4 sm:$0xff]   ;;  %v4961_v34 = vld [vmem:[#allocation2 + $0x18c] ss:$16 sps:$4 sm:$0xff]  }
 0x12b   :  { %v3314_v50 = vpop.f32.mrf.mxu1  ;;  %3566 = vmatpush1.bf16.msra.mxu0 %v4899_v58  ;;  %v4964_v35 = vld [vmem:[#allocation2 + $0x38c] ss:$16 sps:$4 sm:$0xff]   ;;  %v4959_v58 = vld [vmem:[#allocation2 + $0x188] ss:$16 sps:$4 sm:$0xff]  }
 0x12c   :  { %3607 = vmatpush1.bf16.msra.mxu1 %v4902_v36  ;;  %v3274_v51 = vpop.f32.mrf.mxu0  ;;  %3567 = vmatprep.subr.bf16.mxu0 %v4907_v40  ;;  %v4962_v36 = vld [vmem:[#allocation2 + $0x388] ss:$16 sps:$4 sm:$0xff]   ;;  %v4967_v59 = vld [vmem:[#allocation2 + $0x16c] ss:$16 sps:$4 sm:$0xff]  }
 0x12d   :  { %v3315_v54 = vpop.f32.mrf.mxu1  ;;  %3608 = vmatprep.subr.bf16.mxu1 %v4910_v41  ;;  %v4970_v38 = vld [vmem:[#allocation2 + $0x36c] ss:$16 sps:$4 sm:$0xff]   ;;  %v4965_v40 = vld [vmem:[#allocation2 + $0x168] ss:$16 sps:$4 sm:$0xff]  }
 0x12e   :  { %v4968_v41 = vld [vmem:[#allocation2 + $0x368] ss:$16 sps:$4 sm:$0xff]   ;;  %v4979_v51 = vld [vmem:[#allocation2 + $0x12c] ss:$16 sps:$4 sm:$0xff]  }
 0x12f   :  { %3568 = vmatpush1.bf16.msra.mxu0 %v4905_v45  ;;  %v4973_v45 = vld [vmem:[#allocation2 + $0x14c] ss:$16 sps:$4 sm:$0xff]   ;;  %v4971_v47 = vld [vmem:[#allocation2 + $0x148] ss:$16 sps:$4 sm:$0xff]  }
 0x130   :  { %3609 = vmatpush1.bf16.msra.mxu1 %v4908_v46  ;;  %3569 = vmatprep.subr.bf16.mxu0 %v4913_v55  ;;  %v4976_v46 = vld [vmem:[#allocation2 + $0x34c] ss:$16 sps:$4 sm:$0xff]   ;;  %v4974_v50 = vld [vmem:[#allocation2 + $0x348] ss:$16 sps:$4 sm:$0xff]  }
 0x131   :  { %3610 = vmatprep.subr.bf16.mxu1 %v4916_v56  ;;  %v4982_v54 = vld [vmem:[#allocation2 + $0x32c] ss:$16 sps:$4 sm:$0xff]   ;;  %v4977_v55 = vld [vmem:[#allocation2 + $0x128] ss:$16 sps:$4 sm:$0xff]  }
 0x132   :  { %v4980_v56 = vld [vmem:[#allocation2 + $0x328] ss:$16 sps:$4 sm:$0xff]  }
 0x133   :  { %3570 = vmatpush1.bf16.msra.mxu0 %v4911_v60  ;;  %v4985_v60 = vld [vmem:[#allocation2 + $0x10c] ss:$16 sps:$4 sm:$0xff]  }
 0x134   :  { %3611 = vmatpush1.bf16.msra.mxu1 %v4914_v61  ;;  %3571 = vmatprep.subr.bf16.mxu0 %v4919_v63  ;;  %v4988_v61 = vld [vmem:[#allocation2 + $0x30c] ss:$16 sps:$4 sm:$0xff]   ;;  %v4983_v63 = vld [vmem:[#allocation2 + $0x108] ss:$16 sps:$4 sm:$0xff]  }
 0x135   :  { %3612 = vmatprep.subr.bf16.mxu1 %v4922_v62  ;;  %v4986_v62 = vld [vmem:[#allocation2 + $0x308] ss:$16 sps:$4 sm:$0xff]  }
 0x137   :  { %3572 = vmatpush1.bf16.msra.mxu0 %v4917_v3  ;;  %v4991_v3 = vld [vmem:[#allocation2 + $0x4ec] ss:$16 sps:$4 sm:$0xff]  }
 0x138   :  { %3613 = vmatpush1.bf16.msra.mxu1 %v4920_v0  ;;  %3573 = vmatprep.subr.bf16.mxu0 %v4925_v1  ;;  %v4994_v0 = vld [vmem:[#allocation2 + $0x6ec] ss:$16 sps:$4 sm:$0xff]   ;;  %v4989_v1 = vld [vmem:[#allocation2 + $0x4e8] ss:$16 sps:$4 sm:$0xff]  }
 0x139   :  { %3614 = vmatprep.subr.bf16.mxu1 %v4928_v2  ;;  %v4992_v2 = vld [vmem:[#allocation2 + $0x6e8] ss:$16 sps:$4 sm:$0xff]  }
 0x13b   :  { %3574 = vmatpush1.bf16.msra.mxu0 %v4923_v6  ;;  %v4997_v6 = vld [vmem:[#allocation2 + $0x4cc] ss:$16 sps:$4 sm:$0xff]  }
 0x13c   :  { %3615 = vmatpush1.bf16.msra.mxu1 %v4926_v7  ;;  %3575 = vmatprep.subr.bf16.mxu0 %v4931_v8  ;;  %v5000_v7 = vld [vmem:[#allocation2 + $0x6cc] ss:$16 sps:$4 sm:$0xff]  }
 0x13d   :  { %3616 = vmatprep.subr.bf16.mxu1 %v4934_v9 }
 0x13f   :  { %3576 = vmatpush1.bf16.msra.mxu0 %v4929_v39 }
 0x140   :  { %3617 = vmatpush1.bf16.msra.mxu1 %v4932_v12  ;;  %3577 = vmatprep.subr.bf16.mxu0 %v4937_v44  ;;  %v4995_v12 = vld [vmem:[#allocation2 + $0x4c8] ss:$16 sps:$4 sm:$0xff]  }
 0x141   :  { %3618 = vmatprep.subr.bf16.mxu1 %v4940_v13  ;;  %v4998_v44 = vld [vmem:[#allocation2 + $0x6c8] ss:$16 sps:$4 sm:$0xff]  }
 0x143   :  { %3578 = vmatpush1.bf16.msra.mxu0 %v4935_v14 }
 0x144   :  { %3619 = vmatpush1.bf16.msra.mxu1 %v4938_v15  ;;  %3579 = vmatprep.subr.bf16.mxu0 %v4943_v18  ;;  %v5003_v15 = vld [vmem:[#allocation2 + $0x4ac] ss:$16 sps:$4 sm:$0xff]  }
 0x145   :  { %3620 = vmatprep.subr.bf16.mxu1 %v4946_v19  ;;  %v5006_v18 = vld [vmem:[#allocation2 + $0x6ac] ss:$16 sps:$4 sm:$0xff]  }
 0x147   :  { %3580 = vmatpush2.bf16.msra.mxu0 %v4941_v20 }
 0x148   :  { %3621 = vmatpush2.bf16.msra.mxu1 %v4944_v21  ;;  %3581 = vmatprep.subr.bf16.mxu0 %v4949_v22  ;;  %v5001_v21 = vld [vmem:[#allocation2 + $0x4a8] ss:$16 sps:$4 sm:$0xff]  }
 0x149   :  { %3622 = vmatprep.subr.bf16.mxu1 %v4952_v23  ;;  %v5004_v22 = vld [vmem:[#allocation2 + $0x6a8] ss:$16 sps:$4 sm:$0xff]  }
 0x14b   :  { %3582 = vmatpush2.bf16.msra.mxu0 %v4947_v24 }
 0x14c   :  { %3623 = vmatpush2.bf16.msra.mxu1 %v4950_v25  ;;  %3583 = vmatprep.subr.bf16.mxu0 %v4955_v28  ;;  %v5009_v25 = vld [vmem:[#allocation2 + $0x48c] ss:$16 sps:$4 sm:$0xff]  }
 0x14d   :  { %3624 = vmatprep.subr.bf16.mxu1 %v4958_v29  ;;  %v5012_v28 = vld [vmem:[#allocation2 + $0x68c] ss:$16 sps:$4 sm:$0xff]  }
 0x14e   :  { %v5018_v29 = vld [vmem:[#allocation2 + $0x66c] ss:$16 sps:$4 sm:$0xff]  }
 0x14f   :  { %3584 = vmatpush2.bf16.msra.mxu0 %v4953_v30  ;;  %v5013_v30 = vld [vmem:[#allocation2 + $0x468] ss:$16 sps:$4 sm:$0xff]  }
 0x150   :  { %3625 = vmatpush2.bf16.msra.mxu1 %v4956_v31  ;;  %3585 = vmatprep.subr.bf16.mxu0 %v4961_v34  ;;  %v5016_v31 = vld [vmem:[#allocation2 + $0x668] ss:$16 sps:$4 sm:$0xff]   ;;  %v5021_v34 = vld [vmem:[#allocation2 + $0x44c] ss:$16 sps:$4 sm:$0xff]  }
 0x151   :  { %3626 = vmatprep.subr.bf16.mxu1 %v4964_v35  ;;  %v5024_v35 = vld [vmem:[#allocation2 + $0x64c] ss:$16 sps:$4 sm:$0xff]  }
 0x153   :  { %3586 = vmatpush2.bf16.msra.mxu0 %v4959_v58  ;;  %v5019_v58 = vld [vmem:[#allocation2 + $0x448] ss:$16 sps:$4 sm:$0xff]  }
 0x154   :  { %3627 = vmatpush2.bf16.msra.mxu1 %v4962_v36  ;;  %3587 = vmatprep.subr.bf16.mxu0 %v4967_v59  ;;  %v5022_v36 = vld [vmem:[#allocation2 + $0x648] ss:$16 sps:$4 sm:$0xff]   ;;  %v5027_v59 = vld [vmem:[#allocation2 + $0x42c] ss:$16 sps:$4 sm:$0xff]  }
 0x155   :  { %3628 = vmatprep.subr.bf16.mxu1 %v4970_v38  ;;  %v5030_v38 = vld [vmem:[#allocation2 + $0x62c] ss:$16 sps:$4 sm:$0xff]  }
 0x157   :  { %3588 = vmatpush2.bf16.msra.mxu0 %v4965_v40  ;;  %v5025_v40 = vld [vmem:[#allocation2 + $0x428] ss:$16 sps:$4 sm:$0xff]  }
 0x158   :  { %3629 = vmatpush2.bf16.msra.mxu1 %v4968_v41  ;;  %3589 = vmatprep.subr.bf16.mxu0 %v4973_v45  ;;  %v5028_v41 = vld [vmem:[#allocation2 + $0x628] ss:$16 sps:$4 sm:$0xff]   ;;  %v5033_v45 = vld [vmem:[#allocation2 + $0x40c] ss:$16 sps:$4 sm:$0xff]  }
 0x159   :  { %3630 = vmatprep.subr.bf16.mxu1 %v4976_v46  ;;  %v5036_v46 = vld [vmem:[#allocation2 + $0x60c] ss:$16 sps:$4 sm:$0xff]  }
 0x15b   :  { %3590 = vmatpush2.bf16.msra.mxu0 %v4971_v47  ;;  %v5031_v47 = vld [vmem:[#allocation2 + $0x408] ss:$16 sps:$4 sm:$0xff]  }
 0x15c   :  { %3631 = vmatpush2.bf16.msra.mxu1 %v4974_v50  ;;  %3591 = vmatprep.subr.bf16.mxu0 %v4979_v51  ;;  %v5034_v50 = vld [vmem:[#allocation2 + $0x608] ss:$16 sps:$4 sm:$0xff]   ;;  %v5039_v51 = vld [vmem:[#allocation2 + $0x5ec] ss:$16 sps:$4 sm:$0xff]  }
 0x15d   :  { %3632 = vmatprep.subr.bf16.mxu1 %v4982_v54  ;;  %v5042_v54 = vld [vmem:[#allocation2 + $0x7ec] ss:$16 sps:$4 sm:$0xff]  }
 0x15f   :  { %3592 = vmatpush2.bf16.msra.mxu0 %v4977_v55  ;;  %v5037_v55 = vld [vmem:[#allocation2 + $0x5e8] ss:$16 sps:$4 sm:$0xff]  }
 0x160   :  { %3633 = vmatpush2.bf16.msra.mxu1 %v4980_v56  ;;  %3593 = vmatprep.subr.bf16.mxu0 %v4985_v60  ;;  %v5040_v56 = vld [vmem:[#allocation2 + $0x7e8] ss:$16 sps:$4 sm:$0xff]   ;;  %v5045_v60 = vld [vmem:[#allocation2 + $0x5cc] ss:$16 sps:$4 sm:$0xff]  }
 0x161   :  { %3634 = vmatprep.subr.bf16.mxu1 %v4988_v61  ;;  %v5048_v61 = vld [vmem:[#allocation2 + $0x7cc] ss:$16 sps:$4 sm:$0xff]  }
 0x163   :  { %3594 = vmatpush2.bf16.msra.mxu0 %v4983_v63  ;;  %v5043_v63 = vld [vmem:[#allocation2 + $0x5c8] ss:$16 sps:$4 sm:$0xff]  }
 0x164   :  { %3635 = vmatpush2.bf16.msra.mxu1 %v4986_v62  ;;  %3645 = vmatprep.subr.bf16.mxu0 %v4991_v3  ;;  %v5046_v62 = vld [vmem:[#allocation2 + $0x7c8] ss:$16 sps:$4 sm:$0xff]   ;;  %v5051_v3 = vld [vmem:[#allocation2 + $0x5ac] ss:$16 sps:$4 sm:$0xff]  }
 0x165   :  { %3686 = vmatprep.subr.bf16.mxu1 %v4994_v0  ;;  %v5054_v0 = vld [vmem:[#allocation2 + $0x7ac] ss:$16 sps:$4 sm:$0xff]  }
 0x166   :  { %v3351_v8 = vpop.f32.mrf.mxu0  ;;  %3596 = vmatmul.mubr.bf16.vlgmr.msra.gmra.mxu0 %v5420_v16 }
 0x167   :  { %v3392_v9 = vpop.f32.mrf.mxu1  ;;  %3637 = vmatmul.mubr.bf16.vlgmr.msra.gmra.mxu1 %v5422_v17  ;;  %v3352_v39 = vadd.f32 %v3351_v8, %v5513_v37  ;;  %3646 = vmatpush1.bf16.msra.mxu0 %v4989_v1  ;;  %v5049_v1 = vld [vmem:[#allocation2 + $0x5a8] ss:$16 sps:$4 sm:$0xff]  }
 0x168   :  { %3687 = vmatpush1.bf16.msra.mxu1 %v4992_v2  ;;  %v3353_v13 = vpop.f32.mrf.mxu0  ;;  %3647 = vmatprep.subr.bf16.mxu0 %v4997_v6  ;;  %v5052_v2 = vld [vmem:[#allocation2 + $0x7a8] ss:$16 sps:$4 sm:$0xff]   ;;  %v5057_v6 = vld [vmem:[#allocation2 + $0x58c] ss:$16 sps:$4 sm:$0xff]  }
 0x169   :  { %v3394_v14 = vpop.f32.mrf.mxu1  ;;  %3688 = vmatprep.subr.bf16.mxu1 %v5000_v7  ;;  %v5522_v19 = vadd.f32 %v3392_v9, %v3352_v39  ;;  %v3354_v20 = vadd.f32 %v3353_v13, %v5515_v42  ;;  %3677 = vmatprep.mubr.bf16.mxu0 %v5437_v53  ;;  %v5007_v42 = vld [vmem:[#allocation2 + $0x488] ss:$16 sps:$4 sm:$0xff]   ;;  %v5060_v7 = vld [vmem:[#allocation2 + $0x78c] ss:$16 sps:$4 sm:$0xff]  }
 0x16a   :  { %3718 = vmatprep.mubr.bf16.mxu1 %v5441_v57  ;;  %v3355_v16 = vpop.f32.mrf.mxu0  ;;  %v5010_v53 = vld [vmem:[#allocation2 + $0x688] ss:$16 sps:$4 sm:$0xff]   ;;  %v5015_v57 = vld [vmem:[#allocation2 + $0x46c] ss:$16 sps:$4 sm:$0xff]  }
 0x16b   :  { %v3396_v17 = vpop.f32.mrf.mxu1  ;;  %v5527_v37 = vadd.f32 %v3394_v14, %v3354_v20  ;;  %3648 = vmatpush1.bf16.msra.mxu0 %v4995_v12  ;;  %v5055_v8 = vld [vmem:[#allocation2 + $0x588] ss:$16 sps:$4 sm:$0xff]   ;;  %v5063_v39 = vld [vmem:[#allocation2 + $0x56c] ss:$16 sps:$4 sm:$0xff]  }
 0x16c   :  { %3689 = vmatpush1.bf16.msra.mxu1 %v4998_v44  ;;  %v3356_v23 = vpop.f32.mrf.mxu0  ;;  %3649 = vmatprep.subr.bf16.mxu0 %v5003_v15  ;;  %v5058_v9 = vld [vmem:[#allocation2 + $0x788] ss:$16 sps:$4 sm:$0xff]   ;;  %v5066_v12 = vld [vmem:[#allocation2 + $0x76c] ss:$16 sps:$4 sm:$0xff]  }
 0x16d   :  { %v3397_v24 = vpop.f32.mrf.mxu1  ;;  %3690 = vmatprep.subr.bf16.mxu1 %v5006_v18  ;;  %v5061_v44 = vld [vmem:[#allocation2 + $0x568] ss:$16 sps:$4 sm:$0xff]   ;;  %v5069_v14 = vld [vmem:[#allocation2 + $0x54c] ss:$16 sps:$4 sm:$0xff]  }
 0x16e   :  { %v5064_v13 = vld [vmem:[#allocation2 + $0x768] ss:$16 sps:$4 sm:$0xff]   ;;  %v5072_v15 = vld [vmem:[#allocation2 + $0x74c] ss:$16 sps:$4 sm:$0xff]  }
 0x16f   :  { %3650 = vmatpush1.bf16.msra.mxu0 %v5001_v21  ;;  %v5067_v18 = vld [vmem:[#allocation2 + $0x548] ss:$16 sps:$4 sm:$0xff]   ;;  %v5075_v16 = vld [vmem:[#allocation2 + $0x52c] ss:$16 sps:$4 sm:$0xff]  }
 0x170   :  { %3691 = vmatpush1.bf16.msra.mxu1 %v5004_v22  ;;  %3651 = vmatprep.subr.bf16.mxu0 %v5009_v25  ;;  %v5070_v20 = vld [vmem:[#allocation2 + $0x748] ss:$16 sps:$4 sm:$0xff]   ;;  %v5078_v17 = vld [vmem:[#allocation2 + $0x72c] ss:$16 sps:$4 sm:$0xff]  }
 0x171   :  { %3692 = vmatprep.subr.bf16.mxu1 %v5012_v28  ;;  %v5073_v21 = vld [vmem:[#allocation2 + $0x528] ss:$16 sps:$4 sm:$0xff]   ;;  %v5081_v23 = vld [vmem:[#allocation2 + $0x50c] ss:$16 sps:$4 sm:$0xff]  }
 0x172   :  { %v5076_v22 = vld [vmem:[#allocation2 + $0x728] ss:$16 sps:$4 sm:$0xff]   ;;  %v5084_v24 = vld [vmem:[#allocation2 + $0x70c] ss:$16 sps:$4 sm:$0xff]  }
 0x173   :  { %3652 = vmatpush1.bf16.msra.mxu0 %v5007_v42  ;;  %v5079_v25 = vld [vmem:[#allocation2 + $0x508] ss:$16 sps:$4 sm:$0xff]   ;;  %v5087_v42 = vld [vmem:[#allocation2 + $0x8ec] ss:$16 sps:$4 sm:$0xff]  }
 0x174   :  { %3693 = vmatpush1.bf16.msra.mxu1 %v5010_v53  ;;  %3653 = vmatprep.subr.bf16.mxu0 %v5015_v57  ;;  %v5082_v28 = vld [vmem:[#allocation2 + $0x708] ss:$16 sps:$4 sm:$0xff]   ;;  %v5090_v53 = vld [vmem:[#allocation2 + $0xaec] ss:$16 sps:$4 sm:$0xff]  }
 0x175   :  { %3694 = vmatprep.subr.bf16.mxu1 %v5018_v29  ;;  %v5085_v57 = vld [vmem:[#allocation2 + $0x8e8] ss:$16 sps:$4 sm:$0xff]  }
 0x176   :  { %v5088_v29 = vld [vmem:[#allocation2 + $0xae8] ss:$16 sps:$4 sm:$0xff]  }
 0x177   :  { %3654 = vmatpush1.bf16.msra.mxu0 %v5013_v30  ;;  %v5093_v30 = vld [vmem:[#allocation2 + $0x8cc] ss:$16 sps:$4 sm:$0xff]  }
 0x178   :  { %3695 = vmatpush1.bf16.msra.mxu1 %v5016_v31  ;;  %3655 = vmatprep.subr.bf16.mxu0 %v5021_v34  ;;  %v5096_v31 = vld [vmem:[#allocation2 + $0xacc] ss:$16 sps:$4 sm:$0xff]  }
 0x179   :  { %3696 = vmatprep.subr.bf16.mxu1 %v5024_v35 }
 0x17b   :  { %3656 = vmatpush1.bf16.msra.mxu0 %v5019_v58 }
 0x17c   :  { %3697 = vmatpush1.bf16.msra.mxu1 %v5022_v36  ;;  %3657 = vmatprep.subr.bf16.mxu0 %v5027_v59  ;;  %v5091_v36 = vld [vmem:[#allocation2 + $0x8c8] ss:$16 sps:$4 sm:$0xff]  }
 0x17d   :  { %3698 = vmatprep.subr.bf16.mxu1 %v5030_v38  ;;  %v5094_v59 = vld [vmem:[#allocation2 + $0xac8] ss:$16 sps:$4 sm:$0xff]  }
 0x17f   :  { %3658 = vmatpush1.bf16.msra.mxu0 %v5025_v40 }
 0x180   :  { %3699 = vmatpush1.bf16.msra.mxu1 %v5028_v41  ;;  %3659 = vmatprep.subr.bf16.mxu0 %v5033_v45  ;;  %v5099_v41 = vld [vmem:[#allocation2 + $0x8ac] ss:$16 sps:$4 sm:$0xff]  }
 0x181   :  { %3700 = vmatprep.subr.bf16.mxu1 %v5036_v46  ;;  %v5102_v45 = vld [vmem:[#allocation2 + $0xaac] ss:$16 sps:$4 sm:$0xff]  }
 0x183   :  { %3660 = vmatpush1.bf16.msra.mxu0 %v5031_v47 }
 0x184   :  { %3701 = vmatpush1.bf16.msra.mxu1 %v5034_v50  ;;  %3661 = vmatprep.subr.bf16.mxu0 %v5039_v51  ;;  %v5097_v50 = vld [vmem:[#allocation2 + $0x8a8] ss:$16 sps:$4 sm:$0xff]  }
 0x185   :  { %3702 = vmatprep.subr.bf16.mxu1 %v5042_v54  ;;  %v5100_v51 = vld [vmem:[#allocation2 + $0xaa8] ss:$16 sps:$4 sm:$0xff]  }
 0x187   :  { %3662 = vmatpush2.bf16.msra.mxu0 %v5037_v55 }
 0x188   :  { %3703 = vmatpush2.bf16.msra.mxu1 %v5040_v56  ;;  %3663 = vmatprep.subr.bf16.mxu0 %v5045_v60  ;;  %v5105_v56 = vld [vmem:[#allocation2 + $0x88c] ss:$16 sps:$4 sm:$0xff]  }
 0x189   :  { %3704 = vmatprep.subr.bf16.mxu1 %v5048_v61  ;;  %v5108_v60 = vld [vmem:[#allocation2 + $0xa8c] ss:$16 sps:$4 sm:$0xff]  }
 0x18a   :  { %v5114_v61 = vld [vmem:[#allocation2 + $0xa6c] ss:$16 sps:$4 sm:$0xff]  }
 0x18b   :  { %3664 = vmatpush2.bf16.msra.mxu0 %v5043_v63  ;;  %v5109_v63 = vld [vmem:[#allocation2 + $0x868] ss:$16 sps:$4 sm:$0xff]  }
 0x18c   :  { %3705 = vmatpush2.bf16.msra.mxu1 %v5046_v62  ;;  %3665 = vmatprep.subr.bf16.mxu0 %v5051_v3  ;;  %v5112_v62 = vld [vmem:[#allocation2 + $0xa68] ss:$16 sps:$4 sm:$0xff]   ;;  %v5117_v3 = vld [vmem:[#allocation2 + $0x84c] ss:$16 sps:$4 sm:$0xff]  }
 0x18d   :  { %3706 = vmatprep.subr.bf16.mxu1 %v5054_v0  ;;  %v5120_v0 = vld [vmem:[#allocation2 + $0xa4c] ss:$16 sps:$4 sm:$0xff]  }
 0x18f   :  { %3666 = vmatpush2.bf16.msra.mxu0 %v5049_v1  ;;  %v5115_v1 = vld [vmem:[#allocation2 + $0x848] ss:$16 sps:$4 sm:$0xff]  }
 0x190   :  { %3707 = vmatpush2.bf16.msra.mxu1 %v5052_v2  ;;  %3667 = vmatprep.subr.bf16.mxu0 %v5057_v6  ;;  %v5118_v2 = vld [vmem:[#allocation2 + $0xa48] ss:$16 sps:$4 sm:$0xff]   ;;  %v5123_v6 = vld [vmem:[#allocation2 + $0x82c] ss:$16 sps:$4 sm:$0xff]  }
 0x191   :  { %3708 = vmatprep.subr.bf16.mxu1 %v5060_v7  ;;  %v5126_v7 = vld [vmem:[#allocation2 + $0xa2c] ss:$16 sps:$4 sm:$0xff]  }
 0x193   :  { %3668 = vmatpush2.bf16.msra.mxu0 %v5055_v8  ;;  %v5121_v8 = vld [vmem:[#allocation2 + $0x828] ss:$16 sps:$4 sm:$0xff]  }
 0x194   :  { %3709 = vmatpush2.bf16.msra.mxu1 %v5058_v9  ;;  %3669 = vmatprep.subr.bf16.mxu0 %v5063_v39  ;;  %v5124_v9 = vld [vmem:[#allocation2 + $0xa28] ss:$16 sps:$4 sm:$0xff]   ;;  %v5129_v39 = vld [vmem:[#allocation2 + $0x80c] ss:$16 sps:$4 sm:$0xff]  }
 0x195   :  { %3710 = vmatprep.subr.bf16.mxu1 %v5066_v12  ;;  %v5132_v12 = vld [vmem:[#allocation2 + $0xa0c] ss:$16 sps:$4 sm:$0xff]  }
 0x197   :  { %3670 = vmatpush2.bf16.msra.mxu0 %v5061_v44  ;;  %v5127_v44 = vld [vmem:[#allocation2 + $0x808] ss:$16 sps:$4 sm:$0xff]  }
 0x198   :  { %3711 = vmatpush2.bf16.msra.mxu1 %v5064_v13  ;;  %3671 = vmatprep.subr.bf16.mxu0 %v5069_v14  ;;  %v5130_v13 = vld [vmem:[#allocation2 + $0xa08] ss:$16 sps:$4 sm:$0xff]   ;;  %v5135_v14 = vld [vmem:[#allocation2 + $0x9ec] ss:$16 sps:$4 sm:$0xff]  }
 0x199   :  { %3712 = vmatprep.subr.bf16.mxu1 %v5072_v15  ;;  %v5138_v15 = vld [vmem:[#allocation2 + $0xbec] ss:$16 sps:$4 sm:$0xff]  }
 0x19b   :  { %3672 = vmatpush2.bf16.msra.mxu0 %v5067_v18  ;;  %v5133_v18 = vld [vmem:[#allocation2 + $0x9e8] ss:$16 sps:$4 sm:$0xff]  }
 0x19c   :  { %3713 = vmatpush2.bf16.msra.mxu1 %v5070_v20  ;;  %3673 = vmatprep.subr.bf16.mxu0 %v5075_v16  ;;  %v5136_v20 = vld [vmem:[#allocation2 + $0xbe8] ss:$16 sps:$4 sm:$0xff]   ;;  %v5141_v16 = vld [vmem:[#allocation2 + $0x9cc] ss:$16 sps:$4 sm:$0xff]  }
 0x19d   :  { %3714 = vmatprep.subr.bf16.mxu1 %v5078_v17  ;;  %v5144_v17 = vld [vmem:[#allocation2 + $0xbcc] ss:$16 sps:$4 sm:$0xff]  }
 0x19f   :  { %3674 = vmatpush2.bf16.msra.mxu0 %v5073_v21  ;;  %v5139_v21 = vld [vmem:[#allocation2 + $0x9c8] ss:$16 sps:$4 sm:$0xff]  }
 0x1a0   :  { %3715 = vmatpush2.bf16.msra.mxu1 %v5076_v22  ;;  %3675 = vmatprep.subr.bf16.mxu0 %v5081_v23  ;;  %v5142_v22 = vld [vmem:[#allocation2 + $0xbc8] ss:$16 sps:$4 sm:$0xff]   ;;  %v5147_v23 = vld [vmem:[#allocation2 + $0x9ac] ss:$16 sps:$4 sm:$0xff]  }
 0x1a1   :  { %3716 = vmatprep.subr.bf16.mxu1 %v5084_v24  ;;  %v5150_v24 = vld [vmem:[#allocation2 + $0xbac] ss:$16 sps:$4 sm:$0xff]  }
 0x1a3   :  { %3676 = vmatpush2.bf16.msra.mxu0 %v5079_v25  ;;  %v5145_v25 = vld [vmem:[#allocation2 + $0x9a8] ss:$16 sps:$4 sm:$0xff]  }
 0x1a4   :  { %3717 = vmatpush2.bf16.msra.mxu1 %v5082_v28  ;;  %3727 = vmatprep.subr.bf16.mxu0 %v5087_v42  ;;  %v5148_v28 = vld [vmem:[#allocation2 + $0xba8] ss:$16 sps:$4 sm:$0xff]   ;;  %v5153_v42 = vld [vmem:[#allocation2 + $0x98c] ss:$16 sps:$4 sm:$0xff]  }
 0x1a5   :  { %3768 = vmatprep.subr.bf16.mxu1 %v5090_v53  ;;  %v5156_v53 = vld [vmem:[#allocation2 + $0xb8c] ss:$16 sps:$4 sm:$0xff]  }
 0x1a6   :  { %v3433_v34 = vpop.f32.mrf.mxu0  ;;  %3678 = vmatmul.mubr.bf16.vlgmr.msra.gmra.mxu0 %v5447_v32 }
 0x1a7   :  { %v3474_v35 = vpop.f32.mrf.mxu1  ;;  %3719 = vmatmul.mubr.bf16.vlgmr.msra.gmra.mxu1 %v5451_v33  ;;  %v3434_v58 = vadd.f32 %v3433_v34, %v5522_v19  ;;  %3728 = vmatpush1.bf16.msra.mxu0 %v5085_v57  ;;  %v5151_v57 = vld [vmem:[#allocation2 + $0x988] ss:$16 sps:$4 sm:$0xff]  }
 0x1a8   :  { %3769 = vmatpush1.bf16.msra.mxu1 %v5088_v29  ;;  %v3435_v38 = vpop.f32.mrf.mxu0  ;;  %3729 = vmatprep.subr.bf16.mxu0 %v5093_v30  ;;  %v5154_v29 = vld [vmem:[#allocation2 + $0xb88] ss:$16 sps:$4 sm:$0xff]   ;;  %v5159_v30 = vld [vmem:[#allocation2 + $0x96c] ss:$16 sps:$4 sm:$0xff]  }
 0x1a9   :  { %v3476_v40 = vpop.f32.mrf.mxu1  ;;  %3770 = vmatprep.subr.bf16.mxu1 %v5096_v31  ;;  %v5532_v46 = vadd.f32 %v3474_v35, %v3434_v58  ;;  %v3436_v47 = vadd.f32 %v3435_v38, %v5527_v37  ;;  %3759 = vmatprep.mubr.bf16.mxu0 %v5466_v48  ;;  %v5103_v37 = vld [vmem:[#allocation2 + $0x888] ss:$16 sps:$4 sm:$0xff]   ;;  %v5162_v31 = vld [vmem:[#allocation2 + $0xb6c] ss:$16 sps:$4 sm:$0xff]  }
 0x1aa   :  { %3800 = vmatprep.mubr.bf16.mxu1 %v5471_v52  ;;  %v3437_v32 = vpop.f32.mrf.mxu0  ;;  %v5106_v48 = vld [vmem:[#allocation2 + $0xa88] ss:$16 sps:$4 sm:$0xff]   ;;  %v5111_v52 = vld [vmem:[#allocation2 + $0x86c] ss:$16 sps:$4 sm:$0xff]  }
 0x1ab   :  { %v3478_v33 = vpop.f32.mrf.mxu1  ;;  %v5537_v19 = vadd.f32 %v3476_v40, %v3436_v47  ;;  %3730 = vmatpush1.bf16.msra.mxu0 %v5091_v36  ;;  %v5157_v34 = vld [vmem:[#allocation2 + $0x968] ss:$16 sps:$4 sm:$0xff]   ;;  %v5165_v58 = vld [vmem:[#allocation2 + $0x94c] ss:$16 sps:$4 sm:$0xff]  }
 0x1ac   :  { %3771 = vmatpush1.bf16.msra.mxu1 %v5094_v59  ;;  %v3438_v54 = vpop.f32.mrf.mxu0  ;;  %3731 = vmatprep.subr.bf16.mxu0 %v5099_v41  ;;  %v5160_v35 = vld [vmem:[#allocation2 + $0xb68] ss:$16 sps:$4 sm:$0xff]   ;;  %v5168_v36 = vld [vmem:[#allocation2 + $0xb4c] ss:$16 sps:$4 sm:$0xff]  }
 0x1ad   :  { %v3479_v55 = vpop.f32.mrf.mxu1  ;;  %3772 = vmatprep.subr.bf16.mxu1 %v5102_v45  ;;  %v5163_v59 = vld [vmem:[#allocation2 + $0x948] ss:$16 sps:$4 sm:$0xff]   ;;  %v5171_v40 = vld [vmem:[#allocation2 + $0x92c] ss:$16 sps:$4 sm:$0xff]  }
 0x1ae   :  { %v5166_v38 = vld [vmem:[#allocation2 + $0xb48] ss:$16 sps:$4 sm:$0xff]   ;;  %v5174_v41 = vld [vmem:[#allocation2 + $0xb2c] ss:$16 sps:$4 sm:$0xff]  }
 0x1af   :  { %3732 = vmatpush1.bf16.msra.mxu0 %v5097_v50  ;;  %v5169_v45 = vld [vmem:[#allocation2 + $0x928] ss:$16 sps:$4 sm:$0xff]   ;;  %v5177_v32 = vld [vmem:[#allocation2 + $0x90c] ss:$16 sps:$4 sm:$0xff]  }
 0x1b0   :  { %3773 = vmatpush1.bf16.msra.mxu1 %v5100_v51  ;;  %3733 = vmatprep.subr.bf16.mxu0 %v5105_v56  ;;  %v5172_v47 = vld [vmem:[#allocation2 + $0xb28] ss:$16 sps:$4 sm:$0xff]   ;;  %v5180_v33 = vld [vmem:[#allocation2 + $0xb0c] ss:$16 sps:$4 sm:$0xff]  }
 0x1b1   :  { %3774 = vmatprep.subr.bf16.mxu1 %v5108_v60  ;;  %v5175_v50 = vld [vmem:[#allocation2 + $0x908] ss:$16 sps:$4 sm:$0xff]   ;;  %v5183_v54 = vld [vmem:[#allocation2 + $0xcec] ss:$16 sps:$4 sm:$0xff]  }
 0x1b2   :  { %v5178_v51 = vld [vmem:[#allocation2 + $0xb08] ss:$16 sps:$4 sm:$0xff]   ;;  %v5186_v55 = vld [vmem:[#allocation2 + $0xeec] ss:$16 sps:$4 sm:$0xff]  }
 0x1b3   :  { %3734 = vmatpush1.bf16.msra.mxu0 %v5103_v37  ;;  %v5181_v56 = vld [vmem:[#allocation2 + $0xce8] ss:$16 sps:$4 sm:$0xff]   ;;  %v5189_v37 = vld [vmem:[#allocation2 + $0xccc] ss:$16 sps:$4 sm:$0xff]  }
 0x1b4   :  { %3775 = vmatpush1.bf16.msra.mxu1 %v5106_v48  ;;  %3735 = vmatprep.subr.bf16.mxu0 %v5111_v52  ;;  %v5184_v60 = vld [vmem:[#allocation2 + $0xee8] ss:$16 sps:$4 sm:$0xff]   ;;  %v5192_v48 = vld [vmem:[#allocation2 + $0xecc] ss:$16 sps:$4 sm:$0xff]   ;;  %v3899_v52 = vsub.s32 0, %v5404_v43 }
 0x1b5   :  { %3776 = vmatprep.subr.bf16.mxu1 %v5114_v61 }
 0x1b7   :  { %3736 = vmatpush1.bf16.msra.mxu0 %v5109_v63 }
 0x1b8   :  { %3777 = vmatpush1.bf16.msra.mxu1 %v5112_v62  ;;  %3737 = vmatprep.subr.bf16.mxu0 %v5117_v3  ;;  %v5540_v62 = vld [vmem:[#allocation5] sm:$0xf] }
 0x1b9   :  { %3778 = vmatprep.subr.bf16.mxu1 %v5120_v0  ;;  %v3903_v0 = vsub.s32 1, %v5404_v43 }
 0x1bb   :  { %3738 = vmatpush1.bf16.msra.mxu0 %v5115_v1  ;;  %v5187_v1 = vld [vmem:[#allocation2 + $0xcc8] ss:$16 sps:$4 sm:$0xff]  }
 0x1bc   :  { %3779 = vmatpush1.bf16.msra.mxu1 %v5118_v2  ;;  %3739 = vmatprep.subr.bf16.mxu0 %v5123_v6  ;;  %v5190_v2 = vld [vmem:[#allocation2 + $0xec8] ss:$16 sps:$4 sm:$0xff]  }
 0x1bd   :  { %3780 = vmatprep.subr.bf16.mxu1 %v5126_v7 }
 0x1bf   :  { %3740 = vmatpush1.bf16.msra.mxu0 %v5121_v8  ;;  %v5195_v8 = vld [vmem:[#allocation2 + $0xcac] ss:$16 sps:$4 sm:$0xff]  }
 0x1c0   :  { %3781 = vmatpush1.bf16.msra.mxu1 %v5124_v9  ;;  %3741 = vmatprep.subr.bf16.mxu0 %v5129_v39  ;;  %v5198_v9 = vld [vmem:[#allocation2 + $0xeac] ss:$16 sps:$4 sm:$0xff]  }
 0x1c1   :  { %3782 = vmatprep.subr.bf16.mxu1 %v5132_v12  ;;  %v3900_v12 = vrot.slane %v5540_v62, %v3899_v52 }
 0x1c3   :  { %3742 = vmatpush1.bf16.msra.mxu0 %v5127_v44 }
 0x1c4   :  { %3783 = vmatpush1.bf16.msra.mxu1 %v5130_v13  ;;  %3743 = vmatprep.subr.bf16.mxu0 %v5135_v14 }
 0x1c5   :  { %3784 = vmatprep.subr.bf16.mxu1 %v5138_v15  ;;  %v3904_v15 = vrot.slane %v5540_v62, %v3903_v0 }
 0x1c7   :  { %3744 = vmatpush2.bf16.msra.mxu0 %v5133_v18  ;;  %v5193_v18 = vld [vmem:[#allocation2 + $0xca8] ss:$16 sps:$4 sm:$0xff]  }
 0x1c8   :  { %3785 = vmatpush2.bf16.msra.mxu1 %v5136_v20  ;;  %3745 = vmatprep.subr.bf16.mxu0 %v5141_v16  ;;  %v5196_v20 = vld [vmem:[#allocation2 + $0xea8] ss:$16 sps:$4 sm:$0xff]  }
 0x1c9   :  { %3786 = vmatprep.subr.bf16.mxu1 %v5144_v17 }
 0x1cb   :  { %3746 = vmatpush2.bf16.msra.mxu0 %v5139_v21 }
 0x1cc   :  { %3787 = vmatpush2.bf16.msra.mxu1 %v5142_v22  ;;  %3747 = vmatprep.subr.bf16.mxu0 %v5147_v23 }
 0x1cd   :  { %3788 = vmatprep.subr.bf16.mxu1 %v5150_v24 }
 0x1cf   :  { %3748 = vmatpush2.bf16.msra.mxu0 %v5145_v25  ;;  %v5199_v25 = vld [vmem:[#allocation2 + $0xc88] ss:$16 sps:$4 sm:$0xff]  }
 0x1d0   :  { %3789 = vmatpush2.bf16.msra.mxu1 %v5148_v28  ;;  %3749 = vmatprep.subr.bf16.mxu0 %v5153_v42  ;;  %v5202_v28 = vld [vmem:[#allocation2 + $0xe88] ss:$16 sps:$4 sm:$0xff]   ;;  %v5207_v42 = vld [vmem:[#allocation2 + $0xc6c] ss:$16 sps:$4 sm:$0xff]  }
 0x1d1   :  { %3790 = vmatprep.subr.bf16.mxu1 %v5156_v53  ;;  %v5210_v53 = vld [vmem:[#allocation2 + $0xe6c] ss:$16 sps:$4 sm:$0xff]  }
 0x1d3   :  { %3750 = vmatpush2.bf16.msra.mxu0 %v5151_v57 }
 0x1d4   :  { %3791 = vmatpush2.bf16.msra.mxu1 %v5154_v29  ;;  %3751 = vmatprep.subr.bf16.mxu0 %v5159_v30 }
 0x1d5   :  { %3792 = vmatprep.subr.bf16.mxu1 %v5162_v31  ;;  %v5205_v31 = vld [vmem:[#allocation2 + $0xc68] ss:$16 sps:$4 sm:$0xff]  }
 0x1d7   :  { %3752 = vmatpush2.bf16.msra.mxu0 %v5157_v34  ;;  %v5208_v34 = vld [vmem:[#allocation2 + $0xe68] ss:$16 sps:$4 sm:$0xff]  }
 0x1d8   :  { %3793 = vmatpush2.bf16.msra.mxu1 %v5160_v35  ;;  %3753 = vmatprep.subr.bf16.mxu0 %v5165_v58  ;;  %v5213_v35 = vld [vmem:[#allocation2 + $0xc4c] ss:$16 sps:$4 sm:$0xff]  }
 0x1d9   :  { %3794 = vmatprep.subr.bf16.mxu1 %v5168_v36  ;;  %v5216_v58 = vld [vmem:[#allocation2 + $0xe4c] ss:$16 sps:$4 sm:$0xff]   ;;  %v5211_v36 = vld [vmem:[#allocation2 + $0xc48] ss:$16 sps:$4 sm:$0xff]  }
 0x1db   :  { %3754 = vmatpush2.bf16.msra.mxu0 %v5163_v59  ;;  %v5214_v59 = vld [vmem:[#allocation2 + $0xe48] ss:$16 sps:$4 sm:$0xff]  }
 0x1dc   :  { %3795 = vmatpush2.bf16.msra.mxu1 %v5166_v38  ;;  %3755 = vmatprep.subr.bf16.mxu0 %v5171_v40  ;;  %v5219_v38 = vld [vmem:[#allocation2 + $0xc2c] ss:$16 sps:$4 sm:$0xff]  }
 0x1dd   :  { %3796 = vmatprep.subr.bf16.mxu1 %v5174_v41  ;;  %v5222_v40 = vld [vmem:[#allocation2 + $0xe2c] ss:$16 sps:$4 sm:$0xff]   ;;  %v5217_v41 = vld [vmem:[#allocation2 + $0xc28] ss:$16 sps:$4 sm:$0xff]  }
 0x1df   :  { %3756 = vmatpush2.bf16.msra.mxu0 %v5169_v45  ;;  %v5220_v45 = vld [vmem:[#allocation2 + $0xe28] ss:$16 sps:$4 sm:$0xff]  }
 0x1e0   :  { %3797 = vmatpush2.bf16.msra.mxu1 %v5172_v47  ;;  %3757 = vmatprep.subr.bf16.mxu0 %v5177_v32  ;;  %v5225_v47 = vld [vmem:[#allocation2 + $0xc0c] ss:$16 sps:$4 sm:$0xff]  }
 0x1e1   :  { %3798 = vmatprep.subr.bf16.mxu1 %v5180_v33  ;;  %v5228_v32 = vld [vmem:[#allocation2 + $0xe0c] ss:$16 sps:$4 sm:$0xff]   ;;  %v5223_v33 = vld [vmem:[#allocation2 + $0xc08] ss:$16 sps:$4 sm:$0xff]  }
 0x1e3   :  { %3758 = vmatpush2.bf16.msra.mxu0 %v5175_v50  ;;  %v5226_v50 = vld [vmem:[#allocation2 + $0xe08] ss:$16 sps:$4 sm:$0xff]  }
 0x1e4   :  { %3799 = vmatpush2.bf16.msra.mxu1 %v5178_v51  ;;  %3809 = vmatprep.subr.bf16.mxu0 %v5183_v54  ;;  %v5231_v51 = vld [vmem:[#allocation2 + $0xdec] ss:$16 sps:$4 sm:$0xff]  }
 0x1e5   :  { %3850 = vmatprep.subr.bf16.mxu1 %v5186_v55  ;;  %v5234_v54 = vld [vmem:[#allocation2 + $0xfec] ss:$16 sps:$4 sm:$0xff]   ;;  %v5229_v55 = vld [vmem:[#allocation2 + $0xde8] ss:$16 sps:$4 sm:$0xff]  }
 0x1e6   :  { %v3515_v61 = vpop.f32.mrf.mxu0  ;;  %3760 = vmatmul.mubr.bf16.vlgmr.msra.gmra.mxu0 %v5489_v4 }
 0x1e7   :  { %v3556_v63 = vpop.f32.mrf.mxu1  ;;  %3801 = vmatmul.mubr.bf16.vlgmr.msra.gmra.mxu1 %v5493_v5  ;;  %v3516_v3 = vadd.f32 %v3515_v61, %v5532_v46  ;;  %3810 = vmatpush1.bf16.msra.mxu0 %v5181_v56  ;;  %v5550_v5 = vld [vmem:[#allocation7] sm:$0xf]  ;;  %v5232_v56 = vld [vmem:[#allocation2 + $0xfe8] ss:$16 sps:$4 sm:$0xff]   ;;  %v5243_v61 = vld [vmem:[#allocation2 + $0xdac] ss:$16 sps:$4 sm:$0xff]  }
 0x1e8   :  { %3851 = vmatpush1.bf16.msra.mxu1 %v5184_v60  ;;  %v3517_v6 = vpop.f32.mrf.mxu0  ;;  %3811 = vmatprep.subr.bf16.mxu0 %v5189_v37  ;;  %v3930_v23 = vrot.slane %v5550_v5, %v3903_v0  ;;  %v5237_v60 = vld [vmem:[#allocation2 + $0xdcc] ss:$16 sps:$4 sm:$0xff]   ;;  %v5244_v0 = vld [vmem:[#allocation2 + $0xfa8] ss:$16 sps:$4 sm:$0xff]  }
 0x1e9   :  { %v3558_v7 = vpop.f32.mrf.mxu1  ;;  %3852 = vmatprep.subr.bf16.mxu1 %v5192_v48  ;;  %v3557_v39 = vadd.f32 %v3556_v63, %v3516_v3  ;;  %v3518_v4 = vadd.f32 %v3517_v6, %v5537_v19  ;;  %3841 = vmatprep.mubr.bf16.mxu0 %v5495_v10  ;;  %v5201_v19 = vld [vmem:[#allocation2 + $0xc8c] ss:$16 sps:$4 sm:$0xff]   ;;  %v5235_v48 = vld [vmem:[#allocation2 + $0xdc8] ss:$16 sps:$4 sm:$0xff]  }
 0x1ea   :  { %3882 = vmatprep.mubr.bf16.mxu1 %v5497_v11  ;;  %v3519_v46 = vpop.f32.mrf.mxu0  ;;  %v5204_v10 = vld [vmem:[#allocation2 + $0xe8c] ss:$16 sps:$4 sm:$0xff]   ;;  %v3926_v11 = vrot.slane %v5550_v5, %v3899_v52  ;;  %v5238_v52 = vld [vmem:[#allocation2 + $0xfc8] ss:$16 sps:$4 sm:$0xff]  }
 0x1eb   :  { %v3560_v44 = vpop.f32.mrf.mxu1  ;;  %v3891_v13 = vmax.f32 %v3557_v39, 0.0  ;;  %v3559_v14 = vadd.f32 %v3558_v7, %v3518_v4  ;;  %3812 = vmatpush1.bf16.msra.mxu0 %v5187_v1  ;;  %v5240_v37 = vld [vmem:[#allocation2 + $0xfcc] ss:$16 sps:$4 sm:$0xff]   ;;  %v5241_v3 = vld [vmem:[#allocation2 + $0xda8] ss:$16 sps:$4 sm:$0xff]  }
 0x1ec   :  { %3853 = vmatpush1.bf16.msra.mxu1 %v5190_v2  ;;  %v3520_v16 = vpop.f32.mrf.mxu0  ;;  %3813 = vmatprep.subr.bf16.mxu0 %v5195_v8  ;;  %v5246_v63 = vld [vmem:[#allocation2 + $0xfac] ss:$16 sps:$4 sm:$0xff]   ;;  %v5247_v6 = vld [vmem:[#allocation2 + $0xd88] ss:$16 sps:$4 sm:$0xff]  }
 0x1ed   :  { %v3561_v17 = vpop.f32.mrf.mxu1  ;;  %3854 = vmatprep.subr.bf16.mxu1 %v5198_v9  ;;  %v3917_v21 = vmul.f32 %v3900_v12, %v3891_v13  ;;  %v3892_v22 = vmax.f32 %v3559_v14, 0.0  ;;  %v5249_v1 = vld [vmem:[#allocation2 + $0xd8c] ss:$16 sps:$4 sm:$0xff]   ;;  %v5250_v7 = vld [vmem:[#allocation2 + $0xf88] ss:$16 sps:$4 sm:$0xff]  }
 0x1ee   :  { %v5252_v2 = vld [vmem:[#allocation2 + $0xf8c] ss:$16 sps:$4 sm:$0xff]   ;;  %v5253_v39 = vld [vmem:[#allocation2 + $0xd68] ss:$16 sps:$4 sm:$0xff]  }
 0x1ef   :  { %v3918_v24 = vmul.f32 %v3904_v15, %v3892_v22  ;;  %3814 = vmatpush1.bf16.msra.mxu0 %v5193_v18  ;;  %v5555_v57 = vadd.f32 %v3926_v11, %v3917_v21  ;;  %v5255_v8 = vld [vmem:[#allocation2 + $0xd6c] ss:$16 sps:$4 sm:$0xff]   ;;  %v5256_v12 = vld [vmem:[#allocation2 + $0xf68] ss:$16 sps:$4 sm:$0xff]  }
 0x1f0   :  { %3855 = vmatpush1.bf16.msra.mxu1 %v5196_v20  ;;  %3815 = vmatprep.subr.bf16.mxu0 %v5201_v19  ;;  %v5258_v9 = vld [vmem:[#allocation2 + $0xf6c] ss:$16 sps:$4 sm:$0xff]   ;;  %v5259_v44 = vld [vmem:[#allocation2 + $0xd48] ss:$16 sps:$4 sm:$0xff]  }
 0x1f1   :  { %3856 = vmatprep.subr.bf16.mxu1 %v5204_v10  ;;  %v5557_v29 = vadd.f32 %v3930_v23, %v3918_v24  ;;  %v5261_v4 = vld [vmem:[#allocation2 + $0xd4c] ss:$16 sps:$4 sm:$0xff]   ;;  %v5262_v13 = vld [vmem:[#allocation2 + $0xf48] ss:$16 sps:$4 sm:$0xff]  }
 0x1f2   :  { %v5264_v46 = vld [vmem:[#allocation2 + $0xf4c] ss:$16 sps:$4 sm:$0xff]   ;;  %v5265_v18 = vld [vmem:[#allocation2 + $0xd28] ss:$16 sps:$4 sm:$0xff]  }
 0x1f3   :  { %v3951_v30 = vcombine.low %v5555_v57, %v5557_v29  ;;  %3816 = vmatpush1.bf16.msra.mxu0 %v5199_v25  ;;  %v5267_v14 = vld [vmem:[#allocation2 + $0xd2c] ss:$16 sps:$4 sm:$0xff]   ;;  %v5268_v20 = vld [vmem:[#allocation2 + $0xf28] ss:$16 sps:$4 sm:$0xff]  }
 0x1f4   :  { %3857 = vmatpush1.bf16.msra.mxu1 %v5202_v28  ;;  %3817 = vmatprep.subr.bf16.mxu0 %v5207_v42  ;;  %v5270_v15 = vld [vmem:[#allocation2 + $0xf2c] ss:$16 sps:$4 sm:$0xff]   ;;  %v5271_v19 = vld [vmem:[#allocation2 + $0xd08] ss:$16 sps:$4 sm:$0xff]  }
 0x1f5   :  { %3858 = vmatprep.subr.bf16.mxu1 %v5210_v53  ;;  %v5273_v16 = vld [vmem:[#allocation2 + $0xd0c] ss:$16 sps:$4 sm:$0xff]   ;;  %v5274_v10 = vld [vmem:[#allocation2 + $0xf08] ss:$16 sps:$4 sm:$0xff]  }
 0x1f6   :  { %v5276_v17 = vld [vmem:[#allocation2 + $0xf0c] ss:$16 sps:$4 sm:$0xff]  }
 0x1f7   :  { %3818 = vmatpush1.bf16.msra.mxu0 %v5205_v31 }
 0x1f8   :  { %3859 = vmatpush1.bf16.msra.mxu1 %v5208_v34  ;;  %3819 = vmatprep.subr.bf16.mxu0 %v5213_v35 }
 0x1f9   :  { %3860 = vmatprep.subr.bf16.mxu1 %v5216_v58 }
 0x1fb   :  { %3820 = vmatpush1.bf16.msra.mxu0 %v5211_v36 }
 0x1fc   :  { %3861 = vmatpush1.bf16.msra.mxu1 %v5214_v59  ;;  %3821 = vmatprep.subr.bf16.mxu0 %v5219_v38 }
 0x1fd   :  { %3862 = vmatprep.subr.bf16.mxu1 %v5222_v40 }
 0x1ff   :  { %3822 = vmatpush1.bf16.msra.mxu0 %v5217_v41 }
 0x200   :  { %3863 = vmatpush1.bf16.msra.mxu1 %v5220_v45  ;;  %3823 = vmatprep.subr.bf16.mxu0 %v5225_v47 }
 0x201   :  { %3864 = vmatprep.subr.bf16.mxu1 %v5228_v32 }
 0x203   :  { %3824 = vmatpush1.bf16.msra.mxu0 %v5223_v33 }
 0x204   :  { %3865 = vmatpush1.bf16.msra.mxu1 %v5226_v50  ;;  %3825 = vmatprep.subr.bf16.mxu0 %v5231_v51 }
 0x205   :  { %3866 = vmatprep.subr.bf16.mxu1 %v5234_v54 }
 0x207   :  { %3826 = vmatpush2.bf16.msra.mxu0 %v5229_v55 }
 0x208   :  { %3867 = vmatpush2.bf16.msra.mxu1 %v5232_v56  ;;  %3827 = vmatprep.subr.bf16.mxu0 %v5237_v60 }
 0x209   :  { %3868 = vmatprep.subr.bf16.mxu1 %v5240_v37 }
 0x20b   :  { %3828 = vmatpush2.bf16.msra.mxu0 %v5235_v48 }
 0x20c   :  { %3869 = vmatpush2.bf16.msra.mxu1 %v5238_v52  ;;  %3829 = vmatprep.subr.bf16.mxu0 %v5243_v61  ;;  %v3907_v61 = vsub.s32 2, %v5404_v43 }
 0x20d   :  { %3870 = vmatprep.subr.bf16.mxu1 %v5246_v63 }
 0x20f   :  { %3830 = vmatpush2.bf16.msra.mxu0 %v5241_v3 }
 0x210   :  { %3871 = vmatpush2.bf16.msra.mxu1 %v5244_v0  ;;  %3831 = vmatprep.subr.bf16.mxu0 %v5249_v1 }
 0x211   :  { %3872 = vmatprep.subr.bf16.mxu1 %v5252_v2  ;;  %v3911_v2 = vsub.s32 3, %v5404_v43 }
 0x213   :  { %3832 = vmatpush2.bf16.msra.mxu0 %v5247_v6  ;;  %v3938_v43 = vrot.slane %v5550_v5, %v3911_v2 }
 0x214   :  { %3873 = vmatpush2.bf16.msra.mxu1 %v5250_v7  ;;  %3833 = vmatprep.subr.bf16.mxu0 %v5255_v8 }
 0x215   :  { %3874 = vmatprep.subr.bf16.mxu1 %v5258_v9  ;;  %v3908_v9 = vrot.slane %v5540_v62, %v3907_v61 }
 0x217   :  { %3834 = vmatpush2.bf16.msra.mxu0 %v5253_v39 }
 0x218   :  { %3875 = vmatpush2.bf16.msra.mxu1 %v5256_v12  ;;  %3835 = vmatprep.subr.bf16.mxu0 %v5261_v4 }
 0x219   :  { %3876 = vmatprep.subr.bf16.mxu1 %v5264_v46 }
 0x21b   :  { %3836 = vmatpush2.bf16.msra.mxu0 %v5259_v44 }
 0x21c   :  { %3877 = vmatpush2.bf16.msra.mxu1 %v5262_v13  ;;  %3837 = vmatprep.subr.bf16.mxu0 %v5267_v14  ;;  %v3912_v13 = vrot.slane %v5540_v62, %v3911_v2 }
 0x21d   :  { %3878 = vmatprep.subr.bf16.mxu1 %v5270_v15 }
 0x21f   :  { %3838 = vmatpush2.bf16.msra.mxu0 %v5265_v18 }
 0x220   :  { %3879 = vmatpush2.bf16.msra.mxu1 %v5268_v20  ;;  %3839 = vmatprep.subr.bf16.mxu0 %v5273_v16  ;;  %v3934_v20 = vrot.slane %v5550_v5, %v3907_v61 }
 0x221   :  { %3880 = vmatprep.subr.bf16.mxu1 %v5276_v17 }
 0x223   :  { %3840 = vmatpush2.bf16.msra.mxu0 %v5271_v19 }
 0x224   :  { %3881 = vmatpush2.bf16.msra.mxu1 %v5274_v10 }
 0x226   :  { %v3597_v21 = vpop.f32.mrf.mxu0  ;;  %3842 = vmatmul.mubr.bf16.vlgmr.msra.gmra.mxu0 %v5505_v26 }
 0x227   :  { %v3638_v11 = vpop.f32.mrf.mxu1  ;;  %3883 = vmatmul.mubr.bf16.vlgmr.msra.gmra.mxu1 %v5509_v27 }
 0x228   :  { %v3639_v22 = vadd.f32 %v3638_v11, %v3597_v21  ;;  %v3599_v23 = vpop.f32.mrf.mxu0  ;;  %v3959_v11 = vrot.slane %v3951_v30, %v5407_v49 }
 0x229   :  { %v3640_v24 = vpop.f32.mrf.mxu1 }
 0x22a   :  { %v3641_v25 = vadd.f32 %v3640_v24, %v3599_v23  ;;  %v3601_v28 = vpop.f32.mrf.mxu0 }
 0x22b   :  { %v3642_v42 = vpop.f32.mrf.mxu1 }
 0x22c   :  { %v3602_v53 = vpop.f32.mrf.mxu0 }
 0x22d   :  { %v3643_v31 = vpop.f32.mrf.mxu1 }
 0x266   :  { %v3679_v34 = vpop.f32.mrf.mxu0 }
 0x267   :  { %v3720_v35 = vpop.f32.mrf.mxu1  ;;  %v3680_v58 = vadd.f32 %v3679_v34, %v3639_v22 }
 0x268   :  { %v3681_v36 = vpop.f32.mrf.mxu0 }
 0x269   :  { %v3722_v59 = vpop.f32.mrf.mxu1  ;;  %v3721_v38 = vadd.f32 %v3720_v35, %v3680_v58  ;;  %v3682_v40 = vadd.f32 %v3681_v36, %v3641_v25 }
 0x26a   :  { %v3683_v41 = vpop.f32.mrf.mxu0 }
 0x26b   :  { %v3724_v45 = vpop.f32.mrf.mxu1  ;;  %v3723_v26 = vadd.f32 %v3722_v59, %v3682_v40 }
 0x26c   :  { %v3684_v47 = vpop.f32.mrf.mxu0 }
 0x26d   :  { %v3725_v27 = vpop.f32.mrf.mxu1 }
 0x2a6   :  { %v3761_v32 = vpop.f32.mrf.mxu0 }
 0x2a7   :  { %v3802_v33 = vpop.f32.mrf.mxu1  ;;  %v3762_v50 = vadd.f32 %v3761_v32, %v3721_v38 }
 0x2a8   :  { %v3763_v51 = vpop.f32.mrf.mxu0 }
 0x2a9   :  { %v3804_v54 = vpop.f32.mrf.mxu1  ;;  %v3803_v55 = vadd.f32 %v3802_v33, %v3762_v50  ;;  %v3764_v52 = vadd.f32 %v3763_v51, %v3723_v26 }
 0x2aa   :  { %v3765_v56 = vpop.f32.mrf.mxu0 }
 0x2ab   :  { %v3806_v60 = vpop.f32.mrf.mxu1  ;;  %v3805_v0 = vadd.f32 %v3804_v54, %v3764_v52 }
 0x2ac   :  { %v3766_v37 = vpop.f32.mrf.mxu0 }
 0x2ad   :  { %v3807_v48 = vpop.f32.mrf.mxu1 }
 0x2e6   :  { %v3843_v63 = vpop.f32.mrf.mxu0 }
 0x2e7   :  { %v3884_v3 = vpop.f32.mrf.mxu1  ;;  %v3844_v1 = vadd.f32 %v3843_v63, %v3803_v55 }
 0x2e8   :  { %v3845_v6 = vpop.f32.mrf.mxu0 }
 0x2e9   :  { %v3886_v7 = vpop.f32.mrf.mxu1  ;;  %v3885_v8 = vadd.f32 %v3884_v3, %v3844_v1  ;;  %v3846_v39 = vadd.f32 %v3845_v6, %v3805_v0 }
 0x2ea   :  { %v3847_v12 = vpop.f32.mrf.mxu0 }
 0x2eb   :  { %v3888_v4 = vpop.f32.mrf.mxu1  ;;  %v3893_v46 = vmax.f32 %v3885_v8, 0.0  ;;  %v3887_v44 = vadd.f32 %v3886_v7, %v3846_v39 }
 0x2ec   :  { %v3848_v14 = vpop.f32.mrf.mxu0 }
 0x2ed   :  { %v3889_v15 = vpop.f32.mrf.mxu1  ;;  %v3919_v18 = vmul.f32 %v3908_v9, %v3893_v46  ;;  %v3894_v16 = vmax.f32 %v3887_v44, 0.0 }
 0x2ef   :  { %v3920_v17 = vmul.f32 %v3912_v13, %v3894_v16  ;;  %v3945_v19 = vadd.f32 %v3934_v20, %v3919_v18 }
 0x2f1   :  { %v3946_v10 = vadd.f32 %v3938_v43, %v3920_v17 }
 0x2f3   :  { %v3952_v21 = vcombine.low %v3945_v19, %v3946_v10 }
 0x2f5   :  { %v3966_v62 = vrot.slane %v3952_v21, %v5407_v49 }
 0x2f7   :  { %v3967_v22 = vcombine.low %v3959_v11, %v3966_v62 }
 0x2f9   :  { %3969 = vst [vmem:[#allocation8] sm:$0xff] %v3967_v22 }
 0x2fa   :  { %5348 = shalt.err (!%p5345_p5)
}
 0x2fb   :  { %3979 = dma.vmem_to_hbm [thread:$0]  %s3977_s11, 128, %s5581_s4, [#allocation4]  }
 0x2fc   :  { %5361 = dma.done.wait [#allocation4], 128  }
 0x2fd   :  { %5362 = vsyncadd [#allocation4], 4294967168 }
 0x2fe   :  { %3983 = vsyncpa [#allocation3], 1 }
 0x2ff   :  { %3984 = vsyncpa [#allocation6], 1 }
 0x300   :  { %3985 = vsyncpa [#allocation4], 1 }

</bundles_post_ra>
